<compile_context>
chip_gen: v6e
topology: v6e:2x2x1
jax: 0.10.0
libtpu: 0.0.40
codegen_flags: <defaults>
</compile_context>

<pallas_src>
import functools

import numpy as np
import jax
import jax.numpy as jnp
from jax.experimental import pallas as pl
from jax.experimental.pallas import tpu as pltpu

DIM = 256          # relation feature dim (module default)
SPATIAL_IN = 16    # 4 (head box) + 4 (tail box) + 8 (layout feats)


# ----------------------------- Pallas kernel -----------------------------

def _relation_kernel(ht_ref, spat_ref,
                     wd1_ref, bd1_ref,            # diff_fusion first layer
                     ws1_ref, bs1_ref,            # sum_fusion first layer
                     wd2f_ref, ws2f_ref,          # folded (wd2@wf1a), (ws2@wf1a)
                     wspf_ref, bf1f_ref,          # folded spatial weight + folded bias
                     wf2_ref, bf2_ref,            # fusion_fc[2]
                     out_ref):
    # ht_ref: (tn, 2*DIM) f32 -- head in lanes [0, DIM), tail in [DIM, 2*DIM).
    ht = ht_ref[...]
    h = ht[:, :DIM]
    t = ht[:, DIM:]

    # diff / sum in f32 (one downcast each for the MXU; f32 bias/ReLU for v5e).
    diff = (h - t).astype(jnp.bfloat16)
    summ = (h + t).astype(jnp.bfloat16)

    # diff_fusion / sum_fusion first Linear + ReLU
    d = jnp.dot(diff, wd1_ref[...], preferred_element_type=jnp.float32) + bd1_ref[...]
    d = jnp.maximum(d, 0.0).astype(jnp.bfloat16)

    s = jnp.dot(summ, ws1_ref[...], preferred_element_type=jnp.float32) + bs1_ref[...]
    s = jnp.maximum(s, 0.0).astype(jnp.bfloat16)

    # Folded second linears + spatial_proj + fusion_fc[0] in one accumulation:
    #   f = relu_d @ (wd2@wf1a) + relu_s @ (ws2@wf1a) + spat @ (wsp@wf1b) + bf1_fold
    # (chained adds -> on v7x the MRB accumulates in place)
    f = (jnp.dot(d, wd2f_ref[...], preferred_element_type=jnp.float32)
         + jnp.dot(s, ws2f_ref[...], preferred_element_type=jnp.float32)
         + jnp.dot(spat_ref[...], wspf_ref[...], preferred_element_type=jnp.float32)
         + bf1f_ref[...])
    f = jnp.maximum(f, 0.0).astype(jnp.bfloat16)

    # fusion_fc[2]
    out = jnp.dot(f, wf2_ref[...], preferred_element_type=jnp.float32) + bf2_ref[...]
    out_ref[...] = out.astype(out_ref.dtype)


# ----------------------------- JAX glue -----------------------------

def extract_spatial_layout_feats(head_boxes, tail_boxes):
    """Element-wise layout features on [N, 4] xyxy boxes -> [N, 8]."""
    head_center = jnp.stack([(head_boxes[:, 0] + head_boxes[:, 2]) / 2,
                             (head_boxes[:, 1] + head_boxes[:, 3]) / 2], axis=1)
    tail_center = jnp.stack([(tail_boxes[:, 0] + tail_boxes[:, 2]) / 2,
                             (tail_boxes[:, 1] + tail_boxes[:, 3]) / 2], axis=1)
    dxdy = head_center - tail_center
    theta = (jnp.arctan2(dxdy[..., 1], dxdy[..., 0]) / np.pi)[..., None]
    dis = jnp.linalg.norm(dxdy, axis=-1, keepdims=True)

    intersec_lt = jnp.maximum(head_boxes[..., :2], tail_boxes[..., :2])
    intersec_rb = jnp.minimum(head_boxes[..., 2:], tail_boxes[..., 2:])
    overlap = jnp.prod(jnp.clip(intersec_rb - intersec_lt, 0.0, None),
                       axis=-1, keepdims=True)

    union_lt = jnp.minimum(head_boxes[..., :2], tail_boxes[..., :2])
    union_rb = jnp.maximum(head_boxes[..., 2:], tail_boxes[..., 2:])
    union = jnp.prod(jnp.clip(union_rb - union_lt, 0.0, None),
                     axis=-1, keepdims=True)

    head_area = jnp.prod(head_boxes[:, 2:] - head_boxes[:, :2], axis=1, keepdims=True)
    tail_area = jnp.prod(tail_boxes[:, 2:] - tail_boxes[:, :2], axis=1, keepdims=True)

    return jnp.concatenate([dxdy, dis, theta, overlap, union, head_area, tail_area],
                           axis=-1)


def init_params(key):
    """Deterministic synthetic weights (make_fc ~ kaiming-uniform Linear),
    stored [in, out] in f32. These mirror the PyTorch module's layers."""
    def fc(k, fan_in, fan_out):
        kw, kb = jax.random.split(k)
        bound = 1.0 / np.sqrt(fan_in)
        w = jax.random.uniform(kw, (fan_in, fan_out), jnp.float32, -bound, bound)
        b = jax.random.uniform(kb, (1, fan_out), jnp.float32, -bound, bound)
        return w, b

    keys = jax.random.split(key, 7)
    wd1, bd1 = fc(keys[0], DIM, DIM)
    wd2, bd2 = fc(keys[1], DIM, DIM)
    ws1, bs1 = fc(keys[2], DIM, DIM)
    ws2, bs2 = fc(keys[3], DIM, DIM)
    wsp, bsp = fc(keys[4], SPATIAL_IN, DIM)
    wf1, bf1 = fc(keys[5], 2 * DIM, DIM)
    wf2, bf2 = fc(keys[6], DIM, DIM)
    return (wd1, bd1, wd2, bd2, ws1, bs1, ws2, bs2, wsp, bsp, wf1, bf1, wf2, bf2)


def fold_params(params):
    """Offline algebraic folding + bf16 cast of the big weights.
    Exact (up to f32 rounding) rewrite of the original forward:
        Wd2f = wd2 @ wf1a,  Ws2f = ws2 @ wf1a,  Wspf = wsp @ wf1b
        bf1_fold = bf1 + (bd2 + bs2) @ wf1a + bsp @ wf1b
    The tiny spatial weight stays f32 (precision of box distances/areas)."""
    (wd1, bd1, wd2, bd2, ws1, bs1, ws2, bs2, wsp, bsp, wf1, bf1, wf2, bf2) = params
    wf1a, wf1b = wf1[:DIM], wf1[DIM:]          # concat([rel_embed, rel_spatial]) split

    wd2f = wd2 @ wf1a                          # [DIM, DIM]
    ws2f = ws2 @ wf1a                          # [DIM, DIM]
    wspf = wsp @ wf1b                          # [SPATIAL_IN, DIM]  (kept f32)
    bf1_fold = bf1 + (bd2 + bs2) @ wf1a + bsp @ wf1b

    bf16 = lambda a: a.astype(jnp.bfloat16)
    return (bf16(wd1), bd1,
            bf16(ws1), bs1,
            bf16(wd2f), bf16(ws2f),
            wspf, bf1_fold,
            bf16(wf2), bf2)


def _pick_tile(n, tn):
    """Pick the pair-axis tile: cap at tn, but for small N shrink so there are
    >= 2 grid steps (v7x has two TensorCores on the 'parallel' axis)."""
    if n > tn:
        return tn
    half = -(-n // 2)            # ceil(N / 2)
    half = -(-half // 8) * 8     # round up to sublane multiple
    return max(128, min(tn, half))


def relation_feature_extractor(head_tail_reps, pair_boxes_xyxy, kernel_params,
                               tn=512, out_dtype=jnp.float32):
    """head_tail_reps: [N, 2, DIM] f32, pair_boxes_xyxy: [N, 2, 4] f32 -> [N, DIM]."""
    N = head_tail_reps.shape[0]
    tile = _pick_tile(N, tn)
    n_tiles = pl.cdiv(N, tile)

    # Free row-major reshape: head in lanes [0,DIM), tail in [DIM,2*DIM).
    ht = head_tail_reps.reshape(N, 2 * DIM)

    head_boxes = pair_boxes_xyxy[:, 0]
    tail_boxes = pair_boxes_xyxy[:, 1]
    spat = jnp.concatenate(
        [head_boxes, tail_boxes,
         extract_spatial_layout_feats(head_boxes, tail_boxes)], axis=-1)  # [N, 16] f32

    ht_spec = pl.BlockSpec((tile, 2 * DIM), lambda i: (i, 0))
    spat_spec = pl.BlockSpec((tile, SPATIAL_IN), lambda i: (i, 0))
    out_spec = pl.BlockSpec((tile, DIM), lambda i: (i, 0))

    def full_spec(arr):
        # whole-array block, constant index_map -> weight stays VMEM-resident
        return pl.BlockSpec(arr.shape, lambda i: (0, 0))

    in_specs = [ht_spec, spat_spec] + [full_spec(p) for p in kernel_params]

    weight_bytes = sum(int(np.prod(p.shape)) * p.dtype.itemsize for p in kernel_params)
    out_itemsize = jnp.dtype(out_dtype).itemsize
    flops = N * (2 * DIM * DIM * 5 + 2 * SPATIAL_IN * DIM)
    bytes_accessed = (N * (2 * DIM * 4 + SPATIAL_IN * 4 + DIM * out_itemsize)
                      + weight_bytes)

    return pl.pallas_call(
        _relation_kernel,
        out_shape=jax.ShapeDtypeStruct((N, DIM), out_dtype),
        grid=(n_tiles,),
        in_specs=in_specs,
        out_specs=out_spec,
        compiler_params=pltpu.CompilerParams(
            dimension_semantics=("parallel",)),
        cost_estimate=pl.CostEstimate(flops=flops, transcendentals=0,
                                      bytes_accessed=bytes_accessed),
    )(ht, spat, *kernel_params)


# Pure-JAX f32 reference mirroring the PyTorch forward (unfolded weights).
def relation_feature_extractor_ref(head_tail_reps, pair_boxes_xyxy, params):
    (wd1, bd1, wd2, bd2, ws1, bs1, ws2, bs2, wsp, bsp, wf1, bf1, wf2, bf2) = params
    h = head_tail_reps[:, 0]
    t = head_tail_reps[:, 1]
    hb = pair_boxes_xyxy[:, 0]
    tb = pair_boxes_xyxy[:, 1]

    def mm(x, w):
        return jnp.dot(x, w, preferred_element_type=jnp.float32)

    d = mm(jnp.maximum(mm(h - t, wd1) + bd1, 0.0), wd2) + bd2
    s = mm(jnp.maximum(mm(h + t, ws1) + bs1, 0.0), ws2) + bs2
    rel_embed = d + s
    spat_in = jnp.concatenate([hb, tb, extract_spatial_layout_feats(hb, tb)], axis=-1)
    rel_spatial = mm(spat_in, wsp) + bsp
    f = jnp.maximum(mm(jnp.concatenate([rel_embed, rel_spatial], axis=-1), wf1) + bf1, 0.0)
    return mm(f, wf2) + bf2


if __name__ == "__main__":
    key = jax.random.PRNGKey(0)
    k_rep, k_lt, k_wh, k_par = jax.random.split(key, 4)

    N = 200  # number of (head, tail) pairs -- deliberately NOT a tile multiple

    head_tail_reps = jax.random.uniform(k_rep, (N, 2, DIM), jnp.float32, -1.0, 1.0)

    # valid xyxy boxes in [0, 1]
    lt = jax.random.uniform(k_lt, (N, 2, 2), jnp.float32, 0.0, 0.5)
    wh = jax.random.uniform(k_wh, (N, 2, 2), jnp.float32, 0.05, 0.5)
    pair_boxes_xyxy = jnp.concatenate([lt, lt + wh], axis=-1)  # [N, 2, 4]

    params = init_params(k_par)
    kernel_params = jax.tree_util.tree_map(jax.block_until_ready, fold_params(params))

    fwd = jax.jit(relation_feature_extractor, static_argnames=("tn", "out_dtype"))
    out = fwd(head_tail_reps, pair_boxes_xyxy, kernel_params, tn=512)
    out = jax.block_until_ready(out)

    ref = relation_feature_extractor_ref(head_tail_reps, pair_boxes_xyxy, params)
    # tolerance accounts for bf16 MXU inputs (f32 accumulation) + folded-weight
    # f32 accumulation reordering vs. the unfolded f32 reference
    np.testing.assert_allclose(np.asarray(out), np.asarray(ref), rtol=2e-2, atol=2e-2)
    assert out.shape == (N, DIM)

    # TODO(synk): the tiny [N,4]-box atan2/norm layout-feature math stays in plain
    # JAX glue; it is lane-sparse elementwise work with no benefit from Pallas.

    print("KERNEL_OK")
</pallas_src>

<mosaic_0001>
module attributes {stable_mosaic.version = 11 : i64} {
  func.func @_relation_kernel(%arg0: i32, %arg1: memref<128x512xf32, #tpu.memory_space<vmem>>, %arg2: memref<128x16xf32, #tpu.memory_space<vmem>>, %arg3: memref<256x256xbf16, #tpu.memory_space<vmem>>, %arg4: memref<1x256xf32, #tpu.memory_space<vmem>>, %arg5: memref<256x256xbf16, #tpu.memory_space<vmem>>, %arg6: memref<1x256xf32, #tpu.memory_space<vmem>>, %arg7: memref<256x256xbf16, #tpu.memory_space<vmem>>, %arg8: memref<256x256xbf16, #tpu.memory_space<vmem>>, %arg9: memref<16x256xf32, #tpu.memory_space<vmem>>, %arg10: memref<1x256xf32, #tpu.memory_space<vmem>>, %arg11: memref<256x256xbf16, #tpu.memory_space<vmem>>, %arg12: memref<1x256xf32, #tpu.memory_space<vmem>>, %arg13: memref<128x256xf32, #tpu.memory_space<vmem>>) attributes {dimension_semantics = [#tpu.dimension_semantics<parallel>], iteration_bounds = array<i64: 2>, scalar_prefetch = 0 : i64, scratch_operands = 0 : i64, tpu.core_type = #tpu.core_type<tc>, window_params = [{transform_indices = @transform_0, window_bounds = array<i64: 128, 512>}, {transform_indices = @transform_1, window_bounds = array<i64: 128, 16>}, {pipeline_mode = #tpu.pipeline_mode<synchronous>, transform_indices = @transform_2, window_bounds = array<i64: 256, 256>}, {pipeline_mode = #tpu.pipeline_mode<synchronous>, transform_indices = @transform_3, window_bounds = array<i64: 1, 256>}, {pipeline_mode = #tpu.pipeline_mode<synchronous>, transform_indices = @transform_4, window_bounds = array<i64: 256, 256>}, {pipeline_mode = #tpu.pipeline_mode<synchronous>, transform_indices = @transform_5, window_bounds = array<i64: 1, 256>}, {pipeline_mode = #tpu.pipeline_mode<synchronous>, transform_indices = @transform_6, window_bounds = array<i64: 256, 256>}, {pipeline_mode = #tpu.pipeline_mode<synchronous>, transform_indices = @transform_7, window_bounds = array<i64: 256, 256>}, {pipeline_mode = #tpu.pipeline_mode<synchronous>, transform_indices = @transform_8, window_bounds = array<i64: 16, 256>}, {pipeline_mode = #tpu.pipeline_mode<synchronous>, transform_indices = @transform_9, window_bounds = array<i64: 1, 256>}, {pipeline_mode = #tpu.pipeline_mode<synchronous>, transform_indices = @transform_10, window_bounds = array<i64: 256, 256>}, {pipeline_mode = #tpu.pipeline_mode<synchronous>, transform_indices = @transform_11, window_bounds = array<i64: 1, 256>}, {transform_indices = @transform_12, window_bounds = array<i64: 128, 256>}]} {
    %c0 = arith.constant 0 : index
    %c0_0 = arith.constant 0 : index
    %0 = vector.load %arg1[%c0, %c0_0] : memref<128x512xf32, #tpu.memory_space<vmem>>, vector<128x512xf32>
    %1 = vector.extract_strided_slice %0 {offsets = [0, 0], sizes = [128, 256], strides = [1, 1]} : vector<128x512xf32> to vector<128x256xf32>
    %2 = vector.extract_strided_slice %0 {offsets = [0, 256], sizes = [128, 256], strides = [1, 1]} : vector<128x512xf32> to vector<128x256xf32>
    %3 = arith.subf %1, %2 : vector<128x256xf32>
    %4 = arith.truncf %3 : vector<128x256xf32> to vector<128x256xbf16>
    %5 = arith.addf %1, %2 : vector<128x256xf32>
    %6 = arith.truncf %5 : vector<128x256xf32> to vector<128x256xbf16>
    %c0_1 = arith.constant 0 : index
    %c0_2 = arith.constant 0 : index
    %7 = vector.load %arg3[%c0_1, %c0_2] : memref<256x256xbf16, #tpu.memory_space<vmem>>, vector<256x256xbf16>
    %cst = arith.constant dense<0.000000e+00> : vector<128x256xf32>
    %8 = tpu.matmul %4, %7, %cst {dimension_numbers = #tpu.dot_dimension_numbers<[1], [0], [0], [1], [0, 0, 1, 1], [], []>} : vector<128x256xbf16>, vector<256x256xbf16>, vector<128x256xf32> -> vector<128x256xf32>
    %c0_3 = arith.constant 0 : index
    %c0_4 = arith.constant 0 : index
    %9 = vector.load %arg4[%c0_3, %c0_4] : memref<1x256xf32, #tpu.memory_space<vmem>>, vector<1x256xf32>
    %10 = vector.broadcast %9 : vector<1x256xf32> to vector<128x256xf32>
    %11 = arith.addf %8, %10 : vector<128x256xf32>
    %cst_5 = arith.constant 0.000000e+00 : f32
    %12 = vector.broadcast %cst_5 : f32 to vector<128x256xf32>
    %13 = arith.maximumf %11, %12 : vector<128x256xf32>
    %14 = arith.truncf %13 : vector<128x256xf32> to vector<128x256xbf16>
    %c0_6 = arith.constant 0 : index
    %c0_7 = arith.constant 0 : index
    %15 = vector.load %arg5[%c0_6, %c0_7] : memref<256x256xbf16, #tpu.memory_space<vmem>>, vector<256x256xbf16>
    %cst_8 = arith.constant dense<0.000000e+00> : vector<128x256xf32>
    %16 = tpu.matmul %6, %15, %cst_8 {dimension_numbers = #tpu.dot_dimension_numbers<[1], [0], [0], [1], [0, 0, 1, 1], [], []>} : vector<128x256xbf16>, vector<256x256xbf16>, vector<128x256xf32> -> vector<128x256xf32>
    %c0_9 = arith.constant 0 : index
    %c0_10 = arith.constant 0 : index
    %17 = vector.load %arg6[%c0_9, %c0_10] : memref<1x256xf32, #tpu.memory_space<vmem>>, vector<1x256xf32>
    %18 = vector.broadcast %17 : vector<1x256xf32> to vector<128x256xf32>
    %19 = arith.addf %16, %18 : vector<128x256xf32>
    %cst_11 = arith.constant 0.000000e+00 : f32
    %20 = vector.broadcast %cst_11 : f32 to vector<128x256xf32>
    %21 = arith.maximumf %19, %20 : vector<128x256xf32>
    %22 = arith.truncf %21 : vector<128x256xf32> to vector<128x256xbf16>
    %c0_12 = arith.constant 0 : index
    %c0_13 = arith.constant 0 : index
    %23 = vector.load %arg7[%c0_12, %c0_13] : memref<256x256xbf16, #tpu.memory_space<vmem>>, vector<256x256xbf16>
    %cst_14 = arith.constant dense<0.000000e+00> : vector<128x256xf32>
    %24 = tpu.matmul %14, %23, %cst_14 {dimension_numbers = #tpu.dot_dimension_numbers<[1], [0], [0], [1], [0, 0, 1, 1], [], []>} : vector<128x256xbf16>, vector<256x256xbf16>, vector<128x256xf32> -> vector<128x256xf32>
    %c0_15 = arith.constant 0 : index
    %c0_16 = arith.constant 0 : index
    %25 = vector.load %arg8[%c0_15, %c0_16] : memref<256x256xbf16, #tpu.memory_space<vmem>>, vector<256x256xbf16>
    %cst_17 = arith.constant dense<0.000000e+00> : vector<128x256xf32>
    %26 = tpu.matmul %22, %25, %cst_17 {dimension_numbers = #tpu.dot_dimension_numbers<[1], [0], [0], [1], [0, 0, 1, 1], [], []>} : vector<128x256xbf16>, vector<256x256xbf16>, vector<128x256xf32> -> vector<128x256xf32>
    %27 = arith.addf %24, %26 : vector<128x256xf32>
    %c0_18 = arith.constant 0 : index
    %c0_19 = arith.constant 0 : index
    %28 = vector.load %arg2[%c0_18, %c0_19] : memref<128x16xf32, #tpu.memory_space<vmem>>, vector<128x16xf32>
    %c0_20 = arith.constant 0 : index
    %c0_21 = arith.constant 0 : index
    %29 = vector.load %arg9[%c0_20, %c0_21] : memref<16x256xf32, #tpu.memory_space<vmem>>, vector<16x256xf32>
    %cst_22 = arith.constant dense<0.000000e+00> : vector<128x256xf32>
    %30 = tpu.matmul %28, %29, %cst_22 {dimension_numbers = #tpu.dot_dimension_numbers<[1], [0], [0], [1], [0, 0, 1, 1], [], []>} : vector<128x16xf32>, vector<16x256xf32>, vector<128x256xf32> -> vector<128x256xf32>
    %31 = arith.addf %27, %30 : vector<128x256xf32>
    %c0_23 = arith.constant 0 : index
    %c0_24 = arith.constant 0 : index
    %32 = vector.load %arg10[%c0_23, %c0_24] : memref<1x256xf32, #tpu.memory_space<vmem>>, vector<1x256xf32>
    %33 = vector.broadcast %32 : vector<1x256xf32> to vector<128x256xf32>
    %34 = arith.addf %31, %33 : vector<128x256xf32>
    %cst_25 = arith.constant 0.000000e+00 : f32
    %35 = vector.broadcast %cst_25 : f32 to vector<128x256xf32>
    %36 = arith.maximumf %34, %35 : vector<128x256xf32>
    %37 = arith.truncf %36 : vector<128x256xf32> to vector<128x256xbf16>
    %c0_26 = arith.constant 0 : index
    %c0_27 = arith.constant 0 : index
    %38 = vector.load %arg11[%c0_26, %c0_27] : memref<256x256xbf16, #tpu.memory_space<vmem>>, vector<256x256xbf16>
    %cst_28 = arith.constant dense<0.000000e+00> : vector<128x256xf32>
    %39 = tpu.matmul %37, %38, %cst_28 {dimension_numbers = #tpu.dot_dimension_numbers<[1], [0], [0], [1], [0, 0, 1, 1], [], []>} : vector<128x256xbf16>, vector<256x256xbf16>, vector<128x256xf32> -> vector<128x256xf32>
    %c0_29 = arith.constant 0 : index
    %c0_30 = arith.constant 0 : index
    %40 = vector.load %arg12[%c0_29, %c0_30] : memref<1x256xf32, #tpu.memory_space<vmem>>, vector<1x256xf32>
    %41 = vector.broadcast %40 : vector<1x256xf32> to vector<128x256xf32>
    %42 = arith.addf %39, %41 : vector<128x256xf32>
    %c0_31 = arith.constant 0 : index
    %c0_32 = arith.constant 0 : index
    %43 = vector.load %arg13[%c0_31, %c0_32] : memref<128x256xf32, #tpu.memory_space<vmem>>, vector<128x256xf32>
    tpu.vector_store %arg13[%c0_31, %c0_32], %42 {strides = array<i32>} : memref<128x256xf32, #tpu.memory_space<vmem>>, vector<128x256xf32>,
    return
  }
  func.func @transform_0(%arg0: i32) -> (i32, i32) {
    %c0_i32 = arith.constant 0 : i32
    %c0_i32_0 = arith.constant 0 : i32
    return %arg0, %c0_i32 : i32, i32
  }
  func.func @transform_1(%arg0: i32) -> (i32, i32) {
    %c0_i32 = arith.constant 0 : i32
    %c0_i32_0 = arith.constant 0 : i32
    return %arg0, %c0_i32 : i32, i32
  }
  func.func @transform_2(%arg0: i32) -> (i32, i32) {
    %c0_i32 = arith.constant 0 : i32
    %c0_i32_0 = arith.constant 0 : i32
    %c0_i32_1 = arith.constant 0 : i32
    return %c0_i32, %c0_i32_0 : i32, i32
  }
  func.func @transform_3(%arg0: i32) -> (i32, i32) {
    %c0_i32 = arith.constant 0 : i32
    %c0_i32_0 = arith.constant 0 : i32
    %c0_i32_1 = arith.constant 0 : i32
    return %c0_i32, %c0_i32_0 : i32, i32
  }
  func.func @transform_4(%arg0: i32) -> (i32, i32) {
    %c0_i32 = arith.constant 0 : i32
    %c0_i32_0 = arith.constant 0 : i32
    %c0_i32_1 = arith.constant 0 : i32
    return %c0_i32, %c0_i32_0 : i32, i32
  }
  func.func @transform_5(%arg0: i32) -> (i32, i32) {
    %c0_i32 = arith.constant 0 : i32
    %c0_i32_0 = arith.constant 0 : i32
    %c0_i32_1 = arith.constant 0 : i32
    return %c0_i32, %c0_i32_0 : i32, i32
  }
  func.func @transform_6(%arg0: i32) -> (i32, i32) {
    %c0_i32 = arith.constant 0 : i32
    %c0_i32_0 = arith.constant 0 : i32
    %c0_i32_1 = arith.constant 0 : i32
    return %c0_i32, %c0_i32_0 : i32, i32
  }
  func.func @transform_7(%arg0: i32) -> (i32, i32) {
    %c0_i32 = arith.constant 0 : i32
    %c0_i32_0 = arith.constant 0 : i32
    %c0_i32_1 = arith.constant 0 : i32
    return %c0_i32, %c0_i32_0 : i32, i32
  }
  func.func @transform_8(%arg0: i32) -> (i32, i32) {
    %c0_i32 = arith.constant 0 : i32
    %c0_i32_0 = arith.constant 0 : i32
    %c0_i32_1 = arith.constant 0 : i32
    return %c0_i32, %c0_i32_0 : i32, i32
  }
  func.func @transform_9(%arg0: i32) -> (i32, i32) {
    %c0_i32 = arith.constant 0 : i32
    %c0_i32_0 = arith.constant 0 : i32
    %c0_i32_1 = arith.constant 0 : i32
    return %c0_i32, %c0_i32_0 : i32, i32
  }
  func.func @transform_10(%arg0: i32) -> (i32, i32) {
    %c0_i32 = arith.constant 0 : i32
    %c0_i32_0 = arith.constant 0 : i32
    %c0_i32_1 = arith.constant 0 : i32
    return %c0_i32, %c0_i32_0 : i32, i32
  }
  func.func @transform_11(%arg0: i32) -> (i32, i32) {
    %c0_i32 = arith.constant 0 : i32
    %c0_i32_0 = arith.constant 0 : i32
    %c0_i32_1 = arith.constant 0 : i32
    return %c0_i32, %c0_i32_0 : i32, i32
  }
  func.func @transform_12(%arg0: i32) -> (i32, i32) {
    %c0_i32 = arith.constant 0 : i32
    %c0_i32_0 = arith.constant 0 : i32
    return %arg0, %c0_i32 : i32, i32
  }
}

</mosaic_0001>

<bundles_post_ra>
// kernel: relation_feature_extractor.1
= control target key start
LH: loop header
LB: loop body
LE: loop exit
PB: predicated region body
PF: predicated region fallthrough
CT: control target
= control target key end

     0   :  { %17 = vsyncpa [#allocation3], 0  ;;  %s4466_s0 = inlined_call_operand.vmem [shape: f32[200,512], index: 0, kind: input, shape index: {}]   ;;  %s4467_s1 = inlined_call_operand.vmem [shape: f32[200,16], index: 1, kind: input, shape index: {}]   ;;  %s4468_s2 = inlined_call_operand.vmem [shape: bf16[256,256], index: 2, kind: input, shape index: {}]   ;;  %s4469_s3 = inlined_call_operand.vmem [shape: f32[1,256], index: 3, kind: input, shape index: {}]   ;;  %s4470_s4 = inlined_call_operand.vmem [shape: bf16[256,256], index: 4, kind: input, shape index: {}]   ;;  %s4471_s5 = inlined_call_operand.vmem [shape: f32[1,256], index: 5, kind: input, shape index: {}]   ;;  %s4472_s6 = inlined_call_operand.vmem [shape: bf16[256,256], index: 6, kind: input, shape index: {}]   ;;  %s4473_s7 = inlined_call_operand.vmem [shape: bf16[256,256], index: 7, kind: input, shape index: {}]   ;;  %s4474_s8 = inlined_call_operand.vmem [shape: f32[16,256], index: 8, kind: input, shape index: {}]   ;;  %s4475_s9 = inlined_call_operand.vmem [shape: f32[1,256], index: 9, kind: input, shape index: {}]   ;;  %s4476_s10 = inlined_call_operand.vmem [shape: bf16[256,256], index: 10, kind: input, shape index: {}]   ;;  %s4477_s11 = inlined_call_operand.vmem [shape: f32[1,256], index: 11, kind: input, shape index: {}]   ;;  %s4478_s12 = inlined_call_operand.hbm [shape: f32[200,256], index: 12, kind: output, shape index: {}]  }
   0x1   :  { %19 = vsyncpa [#allocation3 + $0x1], 0  ;;  %s3402_s21 = smov 0   ;;  %s3404_s22 = smov 0  }
   0x2   :  { %s3406_s23 = smov 0   ;;  %s3408_s24 = smov 0  }
   0x3 LB: > { %4484 = sst [smem:[#allocation5_spill]] %s3327_s23  ;;  %s3423_s25 = sadd.s32 4294967295, %s3331_s24   ;;  %s3331_s24 = sphi %s3408_s24, %s4497_s24   ;;  %s3327_s23 = sphi %s3406_s23, %s4499_s23   ;;  %s3323_s22 = sphi %s3404_s22, %s4501_s22   ;;  %s3319_s21 = sphi %s3402_s21, %s4500_s21  }
   0x4   : > { %s2789_s26 = sadd.s32 4294967294, %s3331_s24   ;;  %s3427_s27 = sadd.s32 1, %s3331_s24  }
   0x5   : > { %4485 = sst [smem:[#allocation6_spill]] %s3427_s27  ;;  %s294_s28 = sadd.s32 1, %s3327_s23 }
   0x6   : > { %s291_s29 = ssub.s32 %s3331_s24, %s3427_s27  ;;  %p304_p0 = scmp.ne.s32.totalorder %s3327_s23, %s3323_s22 }
   0x7   : > { %p292_p1 = scmp.eq.s32.totalorder %s291_s29, 0  ;;  %p305_p2 = scmp.eq.s32.totalorder %s3423_s25, 1 }
   0x8   : > { %p310_p3 = scmp.ne.s32.totalorder %s3323_s22, %s3319_s21  ;;  %p311_p4 = scmp.eq.s32.totalorder %s2789_s26, 1 }
   0x9   : > { %s3438_s30 = scalar_select %p292_p1, %s3327_s23, %s294_s28  }
   0xa   : > { %p3440_p5 = por %p305_p2, %p304_p0  ;;  %p3444_p6 = por %p311_p4, %p310_p3 }
   0xb   : > { %4486 = sst [smem:[#allocation7_spill]] %s3438_s30  ;;  %p2792_p7 = scmp.ge.s32.totalorder %s3331_s24, 1 }
   0xc   : > { %s4488_s14 = scalar_select %p3444_p6, 1, 0 }
   0xd   : > { %p396_p8 = scmp.lt.s32.totalorder %s3331_s24, 3 }
   0xe   : > { %4489 = sst [smem:[#allocation8_spill]] %s4488_s14 }
   0xf   : > { %p397_p9 = pnand %p2792_p7, %p396_p8 }
  0x11   : > { %400 = sbr.rel (%p397_p9) target bundleno = 851 (0x353), region = 68 }
  0x16   : > { %v3031_v0 = vld [vmem:[%s4468_s2 + $0x74] ss:$8 sps:$4 sm:$0xff]   ;;  %v3035_v2 = vld [vmem:[%s4468_s2 + $0x70] ss:$8 sps:$4 sm:$0xff]   ;;  %v3037_v4 = vld [vmem:[%s4468_s2 + $0x64] ss:$8 sps:$4 sm:$0xff]  }
  0x17   : > { %v3033_v1 = vld [vmem:[%s4470_s4 + $0x74] ss:$8 sps:$4 sm:$0xff]   ;;  %854 = vmatprep.subr.bf16.mxu0 %v3031_v0  ;;  %v3036_v3 = vld [vmem:[%s4470_s4 + $0x70] ss:$8 sps:$4 sm:$0xff]   ;;  %v3039_v5 = vld [vmem:[%s4470_s4 + $0x64] ss:$8 sps:$4 sm:$0xff]  }
  0x18   : > { %1219 = vmatprep.subr.bf16.mxu1 %v3033_v1  ;;  %855 = vmatpush1.bf16.msra.mxu0 %v3035_v2  ;;  %v3041_v6 = vld [vmem:[%s4468_s2 + $0x60] ss:$8 sps:$4 sm:$0xff]   ;;  %v3043_v8 = vld [vmem:[%s4468_s2 + $0x54] ss:$8 sps:$4 sm:$0xff]   ;;  %v3047_v10 = vld [vmem:[%s4468_s2 + $0x50] ss:$8 sps:$4 sm:$0xff]  }
  0x19   : > { %1220 = vmatpush1.bf16.msra.mxu1 %v3036_v3  ;;  %856 = vmatprep.subr.bf16.mxu0 %v3037_v4  ;;  %v3042_v7 = vld [vmem:[%s4470_s4 + $0x60] ss:$8 sps:$4 sm:$0xff]   ;;  %v3045_v9 = vld [vmem:[%s4470_s4 + $0x54] ss:$8 sps:$4 sm:$0xff]   ;;  %v3048_v11 = vld [vmem:[%s4470_s4 + $0x50] ss:$8 sps:$4 sm:$0xff]  }
  0x1a   : > { %1221 = vmatprep.subr.bf16.mxu1 %v3039_v5  ;;  %v3049_v12 = vld [vmem:[%s4468_s2 + $0x44] ss:$8 sps:$4 sm:$0xff]   ;;  %v3053_v14 = vld [vmem:[%s4468_s2 + $0x40] ss:$8 sps:$4 sm:$0xff]   ;;  %v3055_v16 = vld [vmem:[%s4468_s2 + $0x34] ss:$8 sps:$4 sm:$0xff]  }
  0x1b   : > { %v3051_v13 = vld [vmem:[%s4470_s4 + $0x44] ss:$8 sps:$4 sm:$0xff]   ;;  %v3054_v15 = vld [vmem:[%s4470_s4 + $0x40] ss:$8 sps:$4 sm:$0xff]   ;;  %v3057_v17 = vld [vmem:[%s4470_s4 + $0x34] ss:$8 sps:$4 sm:$0xff]  }
  0x1c   : > { %857 = vmatpush1.bf16.msra.mxu0 %v3041_v6  ;;  %v3059_v18 = vld [vmem:[%s4468_s2 + $0x30] ss:$8 sps:$4 sm:$0xff]   ;;  %v3061_v20 = vld [vmem:[%s4468_s2 + $0x24] ss:$8 sps:$4 sm:$0xff]   ;;  %v3065_v22 = vld [vmem:[%s4468_s2 + $0x20] ss:$8 sps:$4 sm:$0xff]  }
  0x1d   : > { %1222 = vmatpush1.bf16.msra.mxu1 %v3042_v7  ;;  %858 = vmatprep.subr.bf16.mxu0 %v3043_v8  ;;  %v3060_v19 = vld [vmem:[%s4470_s4 + $0x30] ss:$8 sps:$4 sm:$0xff]   ;;  %v3063_v21 = vld [vmem:[%s4470_s4 + $0x24] ss:$8 sps:$4 sm:$0xff]   ;;  %v3066_v23 = vld [vmem:[%s4470_s4 + $0x20] ss:$8 sps:$4 sm:$0xff]  }
  0x1e   : > { %1223 = vmatprep.subr.bf16.mxu1 %v3045_v9  ;;  %v3067_v24 = vld [vmem:[%s4468_s2 + $0x14] ss:$8 sps:$4 sm:$0xff]   ;;  %v3071_v26 = vld [vmem:[%s4468_s2 + $0x10] ss:$8 sps:$4 sm:$0xff]   ;;  %v3073_v28 = vld [vmem:[%s4468_s2 + $0x4] ss:$8 sps:$4 sm:$0xff]  }
  0x1f   : > { %v3069_v25 = vld [vmem:[%s4470_s4 + $0x14] ss:$8 sps:$4 sm:$0xff]   ;;  %v3072_v27 = vld [vmem:[%s4470_s4 + $0x10] ss:$8 sps:$4 sm:$0xff]   ;;  %v3075_v29 = vld [vmem:[%s4470_s4 + $0x4] ss:$8 sps:$4 sm:$0xff]  }
  0x20   : > { %859 = vmatpush1.bf16.msra.mxu0 %v3047_v10  ;;  %s3541_s15 = sshll.u32 %s3423_s25, 4  ;;  %v3077_v30 = vld [vmem:[%s4468_s2] ss:$8 sps:$4 sm:$0xff]   ;;  %v3079_v32 = vld [vmem:[%s4468_s2 + $0xf4] ss:$8 sps:$4 sm:$0xff]   ;;  %vm2010_vm0 = vcmask 130048  }
  0x21   : > { %1224 = vmatpush1.bf16.msra.mxu1 %v3048_v11  ;;  %860 = vmatprep.subr.bf16.mxu0 %v3049_v12  ;;  %v3078_v31 = vld [vmem:[%s4470_s4] ss:$8 sps:$4 sm:$0xff]   ;;  %p459_p10 = scmp.lt.s32.totalorder %s3541_s15, 24  ;;  %v3081_v33 = vld [vmem:[%s4470_s4 + $0xf4] ss:$8 sps:$4 sm:$0xff]   ;;  %s450_s29 = sand.u32 1, %s3323_s22  }
  0x22   : > { %1225 = vmatprep.subr.bf16.mxu1 %v3051_v13  ;;  %v3083_v34 = vld [vmem:[%s4468_s2 + $0xf0] ss:$8 sps:$4 sm:$0xff]   ;;  %v3085_v36 = vld [vmem:[%s4468_s2 + $0xe4] ss:$8 sps:$4 sm:$0xff]   ;;  %v3089_v38 = vld [vmem:[%s4468_s2 + $0xe0] ss:$8 sps:$4 sm:$0xff]  }
  0x23   : > { %v3084_v35 = vld [vmem:[%s4470_s4 + $0xf0] ss:$8 sps:$4 sm:$0xff]   ;;  %s3566_s20 = scalar_select %p459_p10, %s3541_s15, 24  ;;  %v3087_v37 = vld [vmem:[%s4470_s4 + $0xe4] ss:$8 sps:$4 sm:$0xff]  }
  0x24   : > { %861 = vmatpush1.bf16.msra.mxu0 %v3053_v14  ;;  %v3090_v39 = vld [vmem:[%s4470_s4 + $0xe0] ss:$8 sps:$4 sm:$0xff]   ;;  %v3091_v40 = vld [vmem:[%s4468_s2 + $0xd4] ss:$8 sps:$4 sm:$0xff]   ;;  %v3095_v42 = vld [vmem:[%s4468_s2 + $0xd0] ss:$8 sps:$4 sm:$0xff]  }
  0x25   : > { %1226 = vmatpush1.bf16.msra.mxu1 %v3054_v15  ;;  %862 = vmatprep.subr.bf16.mxu0 %v3055_v16  ;;  %s2986_s19 = sshll.u32 %s3566_s20, 5  ;;  %v3093_v41 = vld [vmem:[%s4470_s4 + $0xd4] ss:$8 sps:$4 sm:$0xff]   ;;  %v3096_v43 = vld [vmem:[%s4470_s4 + $0xd0] ss:$8 sps:$4 sm:$0xff]   ;;  %s2798_s30 = sshll.u32 %s3566_s20, 3 }
  0x26   : > { %1227 = vmatprep.subr.bf16.mxu1 %v3057_v17  ;;  %s3593_s17 = scalar_lea.vmem %s4466_s0, %s2986_s19  ;;  %v3097_v44 = vld [vmem:[%s4468_s2 + $0xc4] ss:$8 sps:$4 sm:$0xff]   ;;  %v3101_v50 = vld [vmem:[%s4468_s2 + $0xc0] ss:$8 sps:$4 sm:$0xff]   ;;  %v3103_v55 = vld [vmem:[%s4468_s2 + $0xb4] ss:$8 sps:$4 sm:$0xff]   ;;  %s4014_s23 = scalar_lea.vmem %s4467_s1, %s2798_s30 }
  0x27   : > { %v3099_v45 = vld [vmem:[%s4470_s4 + $0xc4] ss:$8 sps:$4 sm:$0xff]   ;;  %v493_v47 = vld [vmem:[%s3593_s17 + $0x18] sm:$0xff]  ;;  %v3102_v51 = vld [vmem:[%s4470_s4 + $0xc0] ss:$8 sps:$4 sm:$0xff]   ;;  %s2793_s16 = sshll.u32 %s450_s29, 8 }
  0x28   : > { %863 = vmatpush1.bf16.msra.mxu0 %v3059_v18  ;;  %v491_v46 = vld [vmem:[%s3593_s17 + $0x8] sm:$0xff]  ;;  %v497_v49 = vld [vmem:[%s3593_s17 + $0x38] sm:$0xff]  ;;  %v490_v7 = vld [vmem:[%s3593_s17] sm:$0xff]  ;;  %s4339_s27 = scalar_lea.vmem [#allocation2], %s2793_s16  ;;  %s4406_s18 = scalar_lea.sflag [#allocation3], %s450_s29 }
  0x29   : > { %1228 = vmatpush1.bf16.msra.mxu1 %v3060_v19  ;;  %864 = vmatprep.subr.bf16.mxu0 %v3061_v20  ;;  %v495_v48 = vld [vmem:[%s3593_s17 + $0x28] sm:$0xff]  ;;  %v555_v52 = vsub.f32 %v491_v46, %v493_v47  ;;  %v603_v54 = vadd.f32 %v493_v47, %v491_v46  ;;  %v3105_v56 = vld [vmem:[%s4470_s4 + $0xb4] ss:$8 sps:$4 sm:$0xff]   ;;  %v3107_v60 = vld [vmem:[%s4468_s2 + $0xb0] ss:$8 sps:$4 sm:$0xff]   ;;  %s2702_s26 = ssub.s32 (%p3440_p5), 25, %s3541_s15 }
  0x2a   : > { %1229 = vmatprep.subr.bf16.mxu1 %v3063_v21  ;;  %v557_v53 = vsub.f32 %v495_v48, %v497_v49  ;;  %v605_v57 = vadd.f32 %v497_v49, %v495_v48  ;;  %v3108_v61 = vld [vmem:[%s4470_s4 + $0xb0] ss:$8 sps:$4 sm:$0xff]   ;;  %v3109_v62 = vld [vmem:[%s4468_s2 + $0xa4] ss:$8 sps:$4 sm:$0xff]   ;;  %v3113_v0 = vld [vmem:[%s4468_s2 + $0xa0] ss:$8 sps:$4 sm:$0xff]  }
  0x2b   : > { %v3111_v63 = vld [vmem:[%s4470_s4 + $0xa4] ss:$8 sps:$4 sm:$0xff]   ;;  %v3114_v1 = vld [vmem:[%s4470_s4 + $0xa0] ss:$8 sps:$4 sm:$0xff]   ;;  %v3115_v2 = vld [vmem:[%s4468_s2 + $0x94] ss:$8 sps:$4 sm:$0xff]  }
  0x2c   : > { %865 = vmatpush1.bf16.msra.mxu0 %v3065_v22  ;;  %v587_v58 = vpack.c.bf16 %v557_v53, %v555_v52  ;;  %v635_v59 = vpack.c.bf16 %v605_v57, %v603_v54  ;;  %v3117_v3 = vld [vmem:[%s4470_s4 + $0x94] ss:$8 sps:$4 sm:$0xff]   ;;  %v3119_v4 = vld [vmem:[%s4468_s2 + $0x90] ss:$8 sps:$4 sm:$0xff]   ;;  %v3121_v6 = vld [vmem:[%s4468_s2 + $0x84] ss:$8 sps:$4 sm:$0xff]  }
  0x2d   : > { %1230 = vmatpush1.bf16.msra.mxu1 %v3066_v23  ;;  %866 = vmatprep.subr.bf16.mxu0 %v3067_v24  ;;  %v3120_v5 = vld [vmem:[%s4470_s4 + $0x90] ss:$8 sps:$4 sm:$0xff]   ;;  %v494_v9 = vld [vmem:[%s3593_s17 + $0x20] sm:$0xff]  ;;  %v499_v11 = vld [vmem:[%s3593_s17 + $0x48] sm:$0xff]  ;;  %p2703_p11 = scmp.lt.s32.totalorder (%p3440_p5), %s2702_s26, 16 }
  0x2e   : > { %1231 = vmatprep.subr.bf16.mxu1 %v3069_v25  ;;  %886 = vmatprep.mubr.bf16.mxu0 %v587_v58  ;;  %v492_v8 = vld [vmem:[%s3593_s17 + $0x10] sm:$0xff]  ;;  %v501_v12 = vld [vmem:[%s3593_s17 + $0x58] sm:$0xff]  ;;  %v3123_v13 = vld [vmem:[%s4470_s4 + $0x84] ss:$8 sps:$4 sm:$0xff]  }
  0x2f   : > { %1251 = vmatprep.mubr.bf16.mxu1 %v635_v59  ;;  %v496_v10 = vld [vmem:[%s3593_s17 + $0x30] sm:$0xff]  ;;  %v503_v14 = vld [vmem:[%s3593_s17 + $0x68] sm:$0xff]  ;;  %v505_v15 = vld [vmem:[%s3593_s17 + $0x78] sm:$0xff]  ;;  %v554_v16 = vsub.f32 %v490_v7, %v492_v8  ;;  %v602_v18 = vadd.f32 %v492_v8, %v490_v7  ;;  %v559_v20 = vsub.f32 %v499_v11, %v501_v12  ;;  %v607_v24 = vadd.f32 %v501_v12, %v499_v11 }
  0x30   : > { %867 = vmatpush1.bf16.msra.mxu0 %v3071_v26  ;;  %v556_v17 = vsub.f32 %v494_v9, %v496_v10  ;;  %v604_v19 = vadd.f32 %v496_v10, %v494_v9  ;;  %v3125_v21 = vld [vmem:[%s4468_s2 + $0x80] ss:$8 sps:$4 sm:$0xff]   ;;  %v561_v23 = vsub.f32 %v503_v14, %v505_v15  ;;  %v609_v25 = vadd.f32 %v505_v15, %v503_v14  ;;  %v3130_v46 = vld [vmem:[%s4472_s6 + $0x70] ss:$8 sps:$4 sm:$0xff]   ;;  %v3135_v47 = vld [vmem:[%s4473_s7 + $0x64] ss:$8 sps:$4 sm:$0xff]  }
  0x31   : > { %1232 = vmatpush1.bf16.msra.mxu1 %v3072_v27  ;;  %868 = vmatprep.subr.bf16.mxu0 %v3073_v28  ;;  %v3126_v22 = vld [vmem:[%s4470_s4 + $0x80] ss:$8 sps:$4 sm:$0xff]   ;;  %v500_v27 = vld [vmem:[%s3593_s17 + $0x50] sm:$0xff]  ;;  %v517_v57 = vld [vmem:[%s3593_s17 + $0xd8] sm:$0xff] }
  0x32   : > { %1233 = vmatprep.subr.bf16.mxu1 %v3075_v29  ;;  %v498_v26 = vld [vmem:[%s3593_s17 + $0x40] sm:$0xff]  ;;  %v504_v29 = vld [vmem:[%s3593_s17 + $0x70] sm:$0xff] }
  0x33   : > { %v502_v28 = vld [vmem:[%s3593_s17 + $0x60] sm:$0xff]  ;;  %v508_v52 = vld [vmem:[%s3593_s17 + $0x90] sm:$0xff] }
  0x34   : > { %869 = vmatpush1.bf16.msra.mxu0 %v3077_v30  ;;  %v586_v30 = vpack.c.bf16 %v556_v17, %v554_v16  ;;  %v510_v53 = vld [vmem:[%s3593_s17 + $0xa0] sm:$0xff]  ;;  %v512_v54 = vld [vmem:[%s3593_s17 + $0xb0] sm:$0xff] }
  0x35   : > { %1234 = vmatpush1.bf16.msra.mxu1 %v3078_v31  ;;  %870 = vmatprep.subr.bf16.mxu0 %v3079_v32  ;;  %v634_v31 = vpack.c.bf16 %v604_v19, %v602_v18  ;;  %v507_v32 = vld [vmem:[%s3593_s17 + $0x88] sm:$0xff]  ;;  %v612_v8 = vadd.f32 %v512_v54, %v510_v53  ;;  %v514_v14 = vld [vmem:[%s3593_s17 + $0xc0] sm:$0xff]  ;;  %v516_v15 = vld [vmem:[%s3593_s17 + $0xd0] sm:$0xff] }
  0x36   : > { %1235 = vmatprep.subr.bf16.mxu1 %v3081_v33  ;;  %v509_v33 = vld [vmem:[%s3593_s17 + $0x98] sm:$0xff]  ;;  %v3133_v58 = vld [vmem:[%s4473_s7 + $0x60] ss:$8 sps:$4 sm:$0xff]   ;;  %v3147_v10 = vld [vmem:[%s4473_s7 + $0x44] ss:$8 sps:$4 sm:$0xff]  }
  0x37   : > { %v611_v49 = vadd.f32 %v509_v33, %v507_v32  ;;  %v518_v16 = vld [vmem:[%s3593_s17 + $0xe0] sm:$0xff]  ;;  %v520_v17 = vld [vmem:[%s3593_s17 + $0xf0] sm:$0xff]  ;;  %v523_v19 = vld [vmem:[%s3593_s17 + $0x108] sm:$0xff] }
  0x38   : > { %871 = vmatpush2.bf16.msra.mxu0 %v3083_v34  ;;  %v511_v34 = vld [vmem:[%s3593_s17 + $0xa8] sm:$0xff]  ;;  %v3142_v18 = vld [vmem:[%s4472_s6 + $0x50] ss:$8 sps:$4 sm:$0xff]  }
  0x39   : > { %1236 = vmatpush2.bf16.msra.mxu1 %v3084_v35  ;;  %872 = vmatprep.subr.bf16.mxu0 %v3085_v36  ;;  %v589_v35 = vpack.c.bf16 %v561_v23, %v559_v20  ;;  %v637_v36 = vpack.c.bf16 %v609_v25, %v607_v24  ;;  %v525_v20 = vld [vmem:[%s3593_s17 + $0x118] sm:$0xff]  ;;  %v527_v25 = vld [vmem:[%s3593_s17 + $0x128] sm:$0xff] }
  0x3a   : > { %1237 = vmatprep.subr.bf16.mxu1 %v3087_v37  ;;  %v513_v37 = vld [vmem:[%s3593_s17 + $0xb8] sm:$0xff] }
  0x3b   : > { %v565_v48 = vsub.f32 %v511_v34, %v513_v37 }
  0x3c   : > { %873 = vmatpush2.bf16.msra.mxu0 %v3089_v38  ;;  %v3129_v38 = vld [vmem:[%s4473_s7 + $0x74] ss:$8 sps:$4 sm:$0xff]  }
  0x3d   : > { %1238 = vmatpush2.bf16.msra.mxu1 %v3090_v39  ;;  %874 = vmatprep.subr.bf16.mxu0 %v3091_v40  ;;  %v558_v39 = vsub.f32 %v498_v26, %v500_v27  ;;  %v560_v40 = vsub.f32 %v502_v28, %v504_v29 }
  0x3e   : > { %1239 = vmatprep.subr.bf16.mxu1 %v3093_v41  ;;  %v3127_v41 = vld [vmem:[%s4473_s7 + $0x70] ss:$8 sps:$4 sm:$0xff]  }
  0x3f   : > { %v588_v59 = vpack.c.bf16 %v560_v40, %v558_v39  ;;  %v619_v40 = vadd.f32 %v525_v20, %v523_v19 }
  0x40   : > { %875 = vmatpush2.bf16.msra.mxu0 %v3095_v42  ;;  %v3132_v42 = vld [vmem:[%s4472_s6 + $0x74] ss:$8 sps:$4 sm:$0xff]  }
  0x41   : > { %1240 = vmatpush2.bf16.msra.mxu1 %v3096_v43  ;;  %876 = vmatprep.subr.bf16.mxu0 %v3097_v44  ;;  %v606_v43 = vadd.f32 %v500_v27, %v498_v26  ;;  %v608_v44 = vadd.f32 %v504_v29, %v502_v28  ;;  %v529_v26 = vld [vmem:[%s3593_s17 + $0x138] sm:$0xff]  ;;  %v3148_v29 = vld [vmem:[%s4472_s6 + $0x40] ss:$8 sps:$4 sm:$0xff]  }
  0x42   : > { %1241 = vmatprep.subr.bf16.mxu1 %v3099_v45  ;;  %v563_v45 = vsub.f32 %v507_v32, %v509_v33  ;;  %v568_v32 = vsub.f32 %v518_v16, %v520_v17  ;;  %v3151_v33 = vld [vmem:[%s4473_s7 + $0x30] ss:$8 sps:$4 sm:$0xff]   ;;  %v573_v39 = vsub.f32 %v527_v25, %v529_v26 }
  0x44   : > { %877 = vmatpush2.bf16.msra.mxu0 %v3101_v50  ;;  %v613_v50 = vadd.f32 %v513_v37, %v511_v34  ;;  %v3156_v34 = vld [vmem:[%s4472_s6 + $0x34] ss:$8 sps:$4 sm:$0xff]   ;;  %v571_v37 = vsub.f32 %v523_v19, %v525_v20 }
  0x45   : > { %1242 = vmatpush2.bf16.msra.mxu1 %v3102_v51  ;;  %878 = vmatprep.subr.bf16.mxu0 %v3103_v55  ;;  %v506_v51 = vld [vmem:[%s3593_s17 + $0x80] sm:$0xff] }
  0x46   : > { %1243 = vmatprep.subr.bf16.mxu1 %v3105_v56  ;;  %v3138_v55 = vld [vmem:[%s4472_s6 + $0x64] ss:$8 sps:$4 sm:$0xff]   ;;  %v610_v7 = vadd.f32 %v508_v52, %v506_v51 }
  0x47   : > { %v515_v56 = vld [vmem:[%s3593_s17 + $0xc8] sm:$0xff] }
  0x48   : > { %879 = vmatpush2.bf16.msra.mxu0 %v3107_v60  ;;  %v636_v60 = vpack.c.bf16 %v608_v44, %v606_v43  ;;  %v567_v9 = vsub.f32 %v515_v56, %v517_v57  ;;  %v615_v12 = vadd.f32 %v517_v57, %v515_v56  ;;  %v638_v24 = vpack.c.bf16 %v612_v8, %v610_v7  ;;  %v524_v43 = vld [vmem:[%s3593_s17 + $0x110] sm:$0xff]  ;;  %v526_v44 = vld [vmem:[%s3593_s17 + $0x120] sm:$0xff] }
  0x49   : > { %1244 = vmatpush2.bf16.msra.mxu1 %v3108_v61  ;;  %880 = vmatprep.subr.bf16.mxu0 %v3109_v62  ;;  %v519_v61 = vld [vmem:[%s3593_s17 + $0xe8] sm:$0xff]  ;;  %v521_v62 = vld [vmem:[%s3593_s17 + $0xf8] sm:$0xff]  ;;  %v532_v7 = vld [vmem:[%s3593_s17 + $0x150] sm:$0xff] }
  0x4a   : > { %1245 = vmatprep.subr.bf16.mxu1 %v3111_v63  ;;  %v591_v63 = vpack.c.bf16 %v565_v48, %v563_v45  ;;  %v569_v11 = vsub.f32 %v519_v61, %v521_v62  ;;  %v528_v45 = vld [vmem:[%s3593_s17 + $0x130] sm:$0xff]  ;;  %v533_v48 = vld [vmem:[%s3593_s17 + $0x158] sm:$0xff]  ;;  %v3160_v57 = vld [vmem:[%s4472_s6 + $0x20] ss:$8 sps:$4 sm:$0xff]  }
  0x4b   : > { %v534_v8 = vld [vmem:[%s3593_s17 + $0x160] sm:$0xff] }
  0x4c   : > { %881 = vmatpush2.bf16.msra.mxu0 %v3113_v0  ;;  %v639_v0 = vpack.c.bf16 %v613_v50, %v611_v49  ;;  %v593_v27 = vpack.c.bf16 %v569_v11, %v567_v9  ;;  %v3157_v49 = vld [vmem:[%s4473_s7 + $0x20] ss:$8 sps:$4 sm:$0xff]   ;;  %v3162_v50 = vld [vmem:[%s4472_s6 + $0x24] ss:$8 sps:$4 sm:$0xff]   ;;  %v536_v9 = vld [vmem:[%s3593_s17 + $0x170] sm:$0xff] }
  0x4d   : > { %1246 = vmatpush2.bf16.msra.mxu1 %v3114_v1  ;;  %882 = vmatprep.subr.bf16.mxu0 %v3115_v2  ;;  %v3136_v1 = vld [vmem:[%s4472_s6 + $0x60] ss:$8 sps:$4 sm:$0xff]   ;;  %v3141_v2 = vld [vmem:[%s4473_s7 + $0x54] ss:$8 sps:$4 sm:$0xff]  }
  0x4e   : > { %1247 = vmatprep.subr.bf16.mxu1 %v3117_v3  ;;  %v562_v3 = vsub.f32 %v506_v51, %v508_v52  ;;  %v539_v11 = vld [vmem:[%s3593_s17 + $0x188] sm:$0xff] }
  0x50   : > { %883 = vmatpush2.bf16.msra.mxu0 %v3119_v4  ;;  %v564_v4 = vsub.f32 %v510_v53, %v512_v54  ;;  %v535_v53 = vld [vmem:[%s3593_s17 + $0x168] sm:$0xff]  ;;  %v537_v54 = vld [vmem:[%s3593_s17 + $0x178] sm:$0xff] }
  0x51   : > { %1248 = vmatpush2.bf16.msra.mxu1 %v3120_v5  ;;  %884 = vmatprep.subr.bf16.mxu0 %v3121_v6  ;;  %v3139_v5 = vld [vmem:[%s4473_s7 + $0x50] ss:$8 sps:$4 sm:$0xff]   ;;  %v3144_v6 = vld [vmem:[%s4472_s6 + $0x54] ss:$8 sps:$4 sm:$0xff]  }
  0x52   : > { %1249 = vmatprep.subr.bf16.mxu1 %v3123_v13  ;;  %v617_v13 = vadd.f32 %v521_v62, %v519_v61  ;;  %v590_v23 = vpack.c.bf16 %v564_v4, %v562_v3  ;;  %v3163_v61 = vld [vmem:[%s4473_s7 + $0x10] ss:$8 sps:$4 sm:$0xff]   ;;  %v3168_v62 = vld [vmem:[%s4472_s6 + $0x14] ss:$8 sps:$4 sm:$0xff]   ;;  %v577_v3 = vsub.f32 %v535_v53, %v537_v54 }
  0x54   : > { %885 = vmatpush2.bf16.msra.mxu0 %v3125_v21  ;;  %v3145_v21 = vld [vmem:[%s4473_s7 + $0x40] ss:$8 sps:$4 sm:$0xff]   ;;  %v641_v28 = vpack.c.bf16 %v617_v13, %v615_v12  ;;  %v541_v12 = vld [vmem:[%s3593_s17 + $0x198] sm:$0xff] }
  0x55   : > { %1250 = vmatpush2.bf16.msra.mxu1 %v3126_v22  ;;  %1604 = vmatprep.subr.bf16.mxu0 %v3129_v38  ;;  %v3150_v22 = vld [vmem:[%s4472_s6 + $0x44] ss:$8 sps:$4 sm:$0xff]   ;;  %v3169_v13 = vld [vmem:[%s4473_s7] ss:$8 sps:$4 sm:$0xff]  }
  0x56   : > { %1877 = vmatprep.subr.bf16.mxu1 %v3132_v42  ;;  %v3159_v38 = vld [vmem:[%s4473_s7 + $0x24] ss:$8 sps:$4 sm:$0xff]  }
  0x57   : > { %887 = vmatmul.mubr.bf16.vlgmr.msra.gmra.mxu0 %v586_v30  ;;  %v3153_v30 = vld [vmem:[%s4473_s7 + $0x34] ss:$8 sps:$4 sm:$0xff]   ;;  %v522_v42 = vld [vmem:[%s3593_s17 + $0x100] sm:$0xff] }
  0x58   : > { %1252 = vmatmul.mubr.bf16.vlgmr.msra.gmra.mxu1 %v634_v31  ;;  %896 = vmatprep.mubr.bf16.mxu0 %v589_v35  ;;  %v566_v31 = vsub.f32 %v514_v14, %v516_v15  ;;  %v614_v35 = vadd.f32 %v516_v15, %v514_v14  ;;  %v3174_v14 = vld [vmem:[%s4472_s6 + $0x4] ss:$8 sps:$4 sm:$0xff]  }
  0x59   : > { %1261 = vmatprep.mubr.bf16.mxu1 %v637_v36  ;;  %1605 = vmatpush1.bf16.msra.mxu0 %v3127_v41  ;;  %v616_v36 = vadd.f32 %v520_v17, %v518_v16  ;;  %v621_v41 = vadd.f32 %v529_v26, %v527_v25  ;;  %v543_v17 = vld [vmem:[%s3593_s17 + $0x1a8] sm:$0xff]  ;;  %v3175_v25 = vld [vmem:[%s4473_s7 + $0xf0] ss:$8 sps:$4 sm:$0xff]   ;;  %v3180_v26 = vld [vmem:[%s4472_s6 + $0xf4] ss:$8 sps:$4 sm:$0xff]  }
  0x5a   : > { %1878 = vmatpush1.bf16.msra.mxu1 %v3130_v46  ;;  %1606 = vmatprep.subr.bf16.mxu0 %v3135_v47  ;;  %v3154_v46 = vld [vmem:[%s4472_s6 + $0x30] ss:$8 sps:$4 sm:$0xff]   ;;  %v531_v47 = vld [vmem:[%s3593_s17 + $0x148] sm:$0xff]  ;;  %v592_v51 = vpack.c.bf16 %v568_v32, %v566_v31 }
  0x5b   : > { %1879 = vmatprep.subr.bf16.mxu1 %v3138_v55  ;;  %v640_v52 = vpack.c.bf16 %v616_v36, %v614_v35  ;;  %v595_v55 = vpack.c.bf16 %v573_v39, %v571_v37  ;;  %v643_v56 = vpack.c.bf16 %v621_v41, %v619_v40  ;;  %v623_v4 = vadd.f32 %v533_v48, %v531_v47  ;;  %v3178_v31 = vld [vmem:[%s4472_s6 + $0xf0] ss:$8 sps:$4 sm:$0xff]   ;;  %v3181_v35 = vld [vmem:[%s4473_s7 + $0xe0] ss:$8 sps:$4 sm:$0xff]   ;;  %v3186_v36 = vld [vmem:[%s4472_s6 + $0xe4] ss:$8 sps:$4 sm:$0xff]  }
  0x5c   : > { %v538_v37 = vld [vmem:[%s3593_s17 + $0x180] sm:$0xff]  ;;  %v544_v40 = vld [vmem:[%s3593_s17 + $0x1b0] sm:$0xff]  ;;  %v547_v41 = vld [vmem:[%s3593_s17 + $0x1c8] sm:$0xff] }
  0x5d   : > { %1607 = vmatpush1.bf16.msra.mxu0 %v3133_v58  ;;  %v3165_v58 = vld [vmem:[%s4473_s7 + $0x14] ss:$8 sps:$4 sm:$0xff]   ;;  %v542_v39 = vld [vmem:[%s3593_s17 + $0x1a0] sm:$0xff] }
  0x5e   : > { %1880 = vmatpush1.bf16.msra.mxu1 %v3136_v1  ;;  %1608 = vmatprep.subr.bf16.mxu0 %v3141_v2  ;;  %v575_v1 = vsub.f32 %v531_v47, %v533_v48  ;;  %v3171_v2 = vld [vmem:[%s4473_s7 + $0x4] ss:$8 sps:$4 sm:$0xff]   ;;  %v3184_v47 = vld [vmem:[%s4472_s6 + $0xe0] ss:$8 sps:$4 sm:$0xff]   ;;  %v3189_v48 = vld [vmem:[%s4473_s7 + $0xd4] ss:$8 sps:$4 sm:$0xff]  }
  0x5f   : > { %897 = vmatmul.mubr.bf16.gmra.mxu0 %v588_v59  ;;  %1881 = vmatprep.subr.bf16.mxu1 %v3144_v6  ;;  %v570_v59 = vsub.f32 %v522_v42, %v524_v43  ;;  %v530_v6 = vld [vmem:[%s3593_s17 + $0x140] sm:$0xff] }
  0x60   : > { %1262 = vmatmul.mubr.bf16.gmra.mxu1 %v636_v60  ;;  %906 = vmatprep.mubr.bf16.mxu0 %v591_v63  ;;  %v572_v60 = vsub.f32 %v526_v44, %v528_v45  ;;  %v618_v63 = vadd.f32 %v524_v43, %v522_v42  ;;  %v597_v19 = vpack.c.bf16 %v577_v3, %v575_v1  ;;  %v549_v42 = vld [vmem:[%s3593_s17 + $0x1d8] sm:$0xff]  ;;  %v546_v1 = vld [vmem:[%s3593_s17 + $0x1c0] sm:$0xff] }
  0x61   : > { %1271 = vmatprep.mubr.bf16.mxu1 %v639_v0  ;;  %1609 = vmatpush1.bf16.msra.mxu0 %v3139_v5  ;;  %v620_v0 = vadd.f32 %v528_v45, %v526_v44  ;;  %v625_v5 = vadd.f32 %v537_v54, %v535_v53  ;;  %v551_v45 = vld [vmem:[%s3593_s17 + $0x1e8] sm:$0xff]  ;;  %v550_v3 = vld [vmem:[%s3593_s17 + $0x1e0] sm:$0xff] }
  0x62   : > { %1610 = vmatprep.subr.bf16.mxu0 %v3147_v10  ;;  %1882 = vmatpush1.bf16.msra.mxu1 %v3142_v18  ;;  %v3166_v10 = vld [vmem:[%s4472_s6 + $0x10] ss:$8 sps:$4 sm:$0xff]   ;;  %v594_v15 = vpack.c.bf16 %v572_v60, %v570_v59  ;;  %v3195_v53 = vld [vmem:[%s4473_s7 + $0xc4] ss:$8 sps:$4 sm:$0xff]  }
  0x63   : > { %1883 = vmatprep.subr.bf16.mxu1 %v3150_v22  ;;  %v642_v16 = vpack.c.bf16 %v620_v0, %v618_v63  ;;  %v545_v18 = vld [vmem:[%s3593_s17 + $0x1b8] sm:$0xff]  ;;  %v645_v20 = vpack.c.bf16 %v625_v5, %v623_v4  ;;  %v3193_v63 = vld [vmem:[%s4473_s7 + $0xc0] ss:$8 sps:$4 sm:$0xff]   ;;  %v3198_v0 = vld [vmem:[%s4472_s6 + $0xc4] ss:$8 sps:$4 sm:$0xff]  }
  0x64   : > { %v3177_v22 = vld [vmem:[%s4473_s7 + $0xf4] ss:$8 sps:$4 sm:$0xff]   ;;  %v581_v32 = vsub.f32 %v543_v17, %v545_v18  ;;  %v3190_v59 = vld [vmem:[%s4472_s6 + $0xd0] ss:$8 sps:$4 sm:$0xff]  }
  0x65   : > { %1611 = vmatpush1.bf16.msra.mxu0 %v3145_v21  ;;  %v3172_v21 = vld [vmem:[%s4472_s6] ss:$8 sps:$4 sm:$0xff]   ;;  %v552_v4 = vld [vmem:[%s3593_s17 + $0x1f0] sm:$0xff] }
  0x66   : > { %1884 = vmatpush1.bf16.msra.mxu1 %v3148_v29  ;;  %1612 = vmatprep.subr.bf16.mxu0 %v3153_v30  ;;  %v624_v29 = vadd.f32 %v536_v9, %v534_v8  ;;  %v579_v30 = vsub.f32 %v539_v11, %v541_v12 }
  0x67   : > { %907 = vmatmul.mubr.bf16.gmra.mxu0 %v590_v23  ;;  %1885 = vmatprep.subr.bf16.mxu1 %v3156_v34  ;;  %v574_v23 = vsub.f32 %v530_v6, %v532_v7  ;;  %v629_v34 = vadd.f32 %v545_v18, %v543_v17  ;;  %v3202_v17 = vld [vmem:[%s4472_s6 + $0xb0] ss:$8 sps:$4 sm:$0xff]  }
  0x68   : > { %1272 = vmatmul.mubr.bf16.gmra.mxu1 %v638_v24  ;;  %916 = vmatprep.mubr.bf16.mxu0 %v593_v27  ;;  %v576_v24 = vsub.f32 %v534_v8, %v536_v9  ;;  %v3183_v27 = vld [vmem:[%s4473_s7 + $0xe4] ss:$8 sps:$4 sm:$0xff]  }
  0x69   : > { %1281 = vmatprep.mubr.bf16.mxu1 %v641_v28  ;;  %1613 = vmatpush1.bf16.msra.mxu0 %v3151_v33  ;;  %v622_v28 = vadd.f32 %v532_v7, %v530_v6  ;;  %v627_v33 = vadd.f32 %v541_v12, %v539_v11  ;;  %v3196_v7 = vld [vmem:[%s4472_s6 + $0xc0] ss:$8 sps:$4 sm:$0xff]   ;;  %v3199_v12 = vld [vmem:[%s4473_s7 + $0xb0] ss:$8 sps:$4 sm:$0xff]  }
  0x6a   : > { %1614 = vmatprep.subr.bf16.mxu0 %v3159_v38  ;;  %1886 = vmatpush1.bf16.msra.mxu1 %v3154_v46  ;;  %v540_v38 = vld [vmem:[%s3593_s17 + $0x190] sm:$0xff]  ;;  %v596_v43 = vpack.c.bf16 %v576_v24, %v574_v23  ;;  %v553_v46 = vld [vmem:[%s3593_s17 + $0x1f8] sm:$0xff]  ;;  %v3208_v23 = vld [vmem:[%s4472_s6 + $0xa0] ss:$8 sps:$4 sm:$0xff]  }
  0x6b   : > { %1887 = vmatprep.subr.bf16.mxu1 %v3162_v50  ;;  %v644_v44 = vpack.c.bf16 %v624_v29, %v622_v28  ;;  %v647_v50 = vpack.c.bf16 %v629_v34, %v627_v33  ;;  %v578_v54 = vsub.f32 %v538_v37, %v540_v38  ;;  %v585_v60 = vsub.f32 %v551_v45, %v553_v46  ;;  %v3213_v24 = vld [vmem:[%s4473_s7 + $0x94] ss:$8 sps:$4 sm:$0xff]   ;;  %v3219_v28 = vld [vmem:[%s4473_s7 + $0x84] ss:$8 sps:$4 sm:$0xff]  }
  0x6c   : > { %v3222_v29 = vld [vmem:[%s4472_s6 + $0x84] ss:$8 sps:$4 sm:$0xff]   ;;  %v684_v33 = vlaneseq }
  0x6d   : > { %1615 = vmatpush1.bf16.msra.mxu0 %v3157_v49  ;;  %v599_v49 = vpack.c.bf16 %v581_v32, %v579_v30  ;;  %v3217_v30 = vld [vmem:[%s4473_s7 + $0x80] ss:$8 sps:$4 sm:$0xff]   ;;  %v2009_v32 = vld [vmem:[%s4474_s8 + $0x18] sm:$0xff] }
  0x6e   : > { %1888 = vmatpush1.bf16.msra.mxu1 %v3160_v57  ;;  %1616 = vmatprep.subr.bf16.mxu0 %v3165_v58  ;;  %v628_v57 = vadd.f32 %v544_v40, %v542_v39  ;;  %v583_v58 = vsub.f32 %v547_v41, %v549_v42  ;;  %v685_v34 = vshrl.u32 %v684_v33, 7 }
  0x6f   : > { %917 = vmatmul.mubr.bf16.gmra.mxu0 %v592_v51  ;;  %1889 = vmatprep.subr.bf16.mxu1 %v3168_v62  ;;  %v3187_v51 = vld [vmem:[%s4473_s7 + $0xd0] ss:$8 sps:$4 sm:$0xff]   ;;  %v633_v62 = vadd.f32 %v553_v46, %v551_v45 }
  0x70   : > { %1282 = vmatmul.mubr.bf16.gmra.mxu1 %v640_v52  ;;  %926 = vmatprep.mubr.bf16.mxu0 %v595_v55  ;;  %v3192_v52 = vld [vmem:[%s4472_s6 + $0xd4] ss:$8 sps:$4 sm:$0xff]   ;;  %v580_v55 = vsub.f32 %v542_v39, %v544_v40  ;;  %v601_v8 = vpack.c.bf16 %v585_v60, %v583_v58  ;;  %v1047_v39 = vld [vmem:[%s4471_s5] sm:$0x3] }
  0x71   : > { %1291 = vmatprep.mubr.bf16.mxu1 %v643_v56  ;;  %1617 = vmatpush1.bf16.msra.mxu0 %v3163_v61  ;;  %v626_v56 = vadd.f32 %v540_v38, %v538_v37  ;;  %v631_v61 = vadd.f32 %v549_v42, %v547_v41  ;;  %v3919_v37 = vsub.s32 1, %v685_v34 }
  0x72   : > { %1618 = vmatprep.subr.bf16.mxu0 %v3171_v2  ;;  %1890 = vmatpush1.bf16.msra.mxu1 %v3166_v10  ;;  %v548_v2 = vld [vmem:[%s3593_s17 + $0x1d0] sm:$0xff]  ;;  %v598_v5 = vpack.c.bf16 %v580_v55, %v578_v54 }
  0x73   : > { %1891 = vmatprep.subr.bf16.mxu1 %v3174_v14  ;;  %v646_v6 = vpack.c.bf16 %v628_v57, %v626_v56  ;;  %v649_v9 = vpack.c.bf16 %v633_v62, %v631_v61  ;;  %v3201_v10 = vld [vmem:[%s4473_s7 + $0xb4] ss:$8 sps:$4 sm:$0xff]   ;;  %v582_v11 = vsub.f32 %v546_v1, %v548_v2  ;;  %v584_v14 = vsub.f32 %v550_v3, %v552_v4 }
  0x75   : > { %1619 = vmatpush1.bf16.msra.mxu0 %v3169_v13  ;;  %v3204_v13 = vld [vmem:[%s4472_s6 + $0xb4] ss:$8 sps:$4 sm:$0xff]   ;;  %v600_v18 = vpack.c.bf16 %v584_v14, %v582_v11 }
  0x76   : > { %1892 = vmatpush1.bf16.msra.mxu1 %v3172_v21  ;;  %1620 = vmatprep.subr.bf16.mxu0 %v3177_v22  ;;  %v3210_v21 = vld [vmem:[%s4472_s6 + $0xa4] ss:$8 sps:$4 sm:$0xff]   ;;  %v3205_v22 = vld [vmem:[%s4473_s7 + $0xa0] ss:$8 sps:$4 sm:$0xff]  }
  0x77   : > { %927 = vmatmul.mubr.bf16.gmra.mxu0 %v594_v15  ;;  %1893 = vmatprep.subr.bf16.mxu1 %v3180_v26  ;;  %v630_v15 = vadd.f32 %v548_v2, %v546_v1  ;;  %v3211_v26 = vld [vmem:[%s4473_s7 + $0x90] ss:$8 sps:$4 sm:$0xff]  }
  0x78   : > { %1292 = vmatmul.mubr.bf16.gmra.mxu1 %v642_v16  ;;  %936 = vmatprep.mubr.bf16.mxu0 %v597_v19  ;;  %v632_v16 = vadd.f32 %v552_v4, %v550_v3 }
  0x79   : > { %1301 = vmatprep.mubr.bf16.mxu1 %v645_v20  ;;  %1621 = vmatpush2.bf16.msra.mxu0 %v3175_v25  ;;  %v3207_v20 = vld [vmem:[%s4473_s7 + $0xa4] ss:$8 sps:$4 sm:$0xff]   ;;  %v3216_v25 = vld [vmem:[%s4472_s6 + $0x94] ss:$8 sps:$4 sm:$0xff]  }
  0x7a   : > { %1622 = vmatprep.subr.bf16.mxu0 %v3183_v27  ;;  %1894 = vmatpush2.bf16.msra.mxu1 %v3178_v31  ;;  %v648_v19 = vpack.c.bf16 %v632_v16, %v630_v15  ;;  %v3214_v27 = vld [vmem:[%s4472_s6 + $0x90] ss:$8 sps:$4 sm:$0xff]   ;;  %v3220_v31 = vld [vmem:[%s4472_s6 + $0x80] ss:$8 sps:$4 sm:$0xff]  }
  0x7b   : > { %1895 = vmatprep.subr.bf16.mxu1 %v3186_v36  ;;  %v3917_v36 = vsub.s32 0, %v685_v34  ;;  %v2008_v15 = vld [vmem:[%s4474_s8 + $0x10] sm:$0xff] }
  0x7d   : > { %1623 = vmatpush2.bf16.msra.mxu0 %v3181_v35  ;;  %v682_v35 = vld [vmem:[%s4469_s3] sm:$0x3]  ;;  %4490 = vst [vmem:[#allocation9_spill] sm:$0xff] %v3917_v36  ;;  %v3935_v45 = vrot.slane %v1047_v39, %v3917_v36 }
  0x7e   : > { %1896 = vmatpush2.bf16.msra.mxu1 %v3184_v47  ;;  %1624 = vmatprep.subr.bf16.mxu0 %v3189_v48  ;;  %v3922_v38 = vrot.slane %v682_v35, %v3917_v36  ;;  %v3928_v40 = vrot.slane %v682_v35, %v3919_v37 }
  0x7f   : > { %937 = vmatmul.mubr.bf16.gmra.mxu0 %v596_v43  ;;  %1897 = vmatprep.subr.bf16.mxu1 %v3192_v52  ;;  %v3931_v43 = vrot.slane %v1047_v39, %v3919_v37 }
  0x80   : > { %1302 = vmatmul.mubr.bf16.gmra.mxu1 %v644_v44  ;;  %946 = vmatprep.mubr.bf16.mxu0 %v599_v49 }
  0x81   : > { %1311 = vmatprep.mubr.bf16.mxu1 %v647_v50  ;;  %1625 = vmatpush2.bf16.msra.mxu0 %v3187_v51 }
  0x82   : > { %1626 = vmatprep.subr.bf16.mxu0 %v3195_v53  ;;  %1898 = vmatpush2.bf16.msra.mxu1 %v3190_v59 }
  0x83   : > { %1899 = vmatprep.subr.bf16.mxu1 %v3198_v0 }
  0x85   : > { %1627 = vmatpush2.bf16.msra.mxu0 %v3193_v63 }
  0x86   : > { %1900 = vmatpush2.bf16.msra.mxu1 %v3196_v7  ;;  %1628 = vmatprep.subr.bf16.mxu0 %v3201_v10 }
  0x87   : > { %947 = vmatmul.mubr.bf16.gmra.mxu0 %v598_v5  ;;  %1901 = vmatprep.subr.bf16.mxu1 %v3204_v13 }
  0x88   : > { %1312 = vmatmul.mubr.bf16.gmra.mxu1 %v646_v6  ;;  %956 = vmatprep.mubr.bf16.mxu0 %v601_v8 }
  0x89   : > { %1321 = vmatprep.mubr.bf16.mxu1 %v649_v9  ;;  %1629 = vmatpush2.bf16.msra.mxu0 %v3199_v12 }
  0x8a   : > { %1902 = vmatpush2.bf16.msra.mxu1 %v3202_v17  ;;  %1630 = vmatprep.subr.bf16.mxu0 %v3207_v20 }
  0x8b   : > { %1903 = vmatprep.subr.bf16.mxu1 %v3210_v21 }
  0x8d   : > { %1631 = vmatpush2.bf16.msra.mxu0 %v3205_v22 }
  0x8e   : > { %1904 = vmatpush2.bf16.msra.mxu1 %v3208_v23  ;;  %1632 = vmatprep.subr.bf16.mxu0 %v3213_v24  ;;  %v2006_v24 = vld [vmem:[%s4474_s8] sm:$0xff] }
  0x8f   : > { %957 = vmatmul.mubr.bf16.gmra.mxu0 %v600_v18  ;;  %1905 = vmatprep.subr.bf16.mxu1 %v3216_v25 }
  0x90   : > { %1322 = vmatmul.mubr.bf16.gmra.mxu1 %v648_v19  ;;  %v2007_v19 = vld [vmem:[%s4474_s8 + $0x8] sm:$0xff] }
  0x91   : > { %1633 = vmatpush2.bf16.msra.mxu0 %v3211_v26 }
  0x92   : > { %1906 = vmatpush2.bf16.msra.mxu1 %v3214_v27  ;;  %1634 = vmatprep.subr.bf16.mxu0 %v3219_v28 }
  0x93   : > { %1907 = vmatprep.subr.bf16.mxu1 %v3222_v29 }
  0x95   : > { %1635 = vmatpush2.bf16.msra.mxu0 %v3217_v30 }
  0x96   : > { %1908 = vmatpush2.bf16.msra.mxu1 %v3220_v31  ;;  %2087 = vmatprep.subr.mxu0 %v2009_v32 }
 0x117   : > { %v888_v41 = vpop.f32.mrf.mxu0 }
 0x118   : > { %v1253_v42 = vpop.f32.mrf.mxu1  ;;  %v889_v44 = vadd.f32 %v888_v41, %v3922_v38 }
 0x119   : > { %v890_v46 = vpop.f32.mrf.mxu0  ;;  %v1254_v55 = vadd.f32 %v1253_v42, %v3935_v45 }
 0x11a   : > { %v1255_v47 = vpop.f32.mrf.mxu1  ;;  %v891_v48 = vadd.f32 %v890_v46, %v3928_v40  ;;  %v967_v54 = vmax.f32 %v889_v44, 0.0 }
 0x11b   : > { %v892_v49 = vpop.f32.mrf.mxu0  ;;  %v1256_v51 = vadd.f32 %v1255_v47, %v3931_v43  ;;  %v1332_v4 = vmax.f32 %v1254_v55, 0.0 }
 0x11c   : > { %v1257_v50 = vpop.f32.mrf.mxu1  ;;  %v893_v52 = vadd.f32 %v892_v49, %v3922_v38  ;;  %v968_v58 = vmax.f32 %v891_v48, 0.0 }
 0x11d   : > { %v1258_v53 = vadd.f32 %v1257_v50, %v3935_v45  ;;  %v894_v56 = vpop.f32.mrf.mxu0  ;;  %v1333_v1 = vmax.f32 %v1256_v51, 0.0 }
 0x11e   : > { %v1259_v57 = vpop.f32.mrf.mxu1  ;;  %v969_v59 = vmax.f32 %v893_v52, 0.0  ;;  %v895_v60 = vadd.f32 %v894_v56, %v3928_v40 }
 0x11f   : > { %v1260_v61 = vadd.f32 %v1259_v57, %v3931_v43  ;;  %v1334_v62 = vmax.f32 %v1258_v53, 0.0  ;;  %v898_v63 = vpop.f32.mrf.mxu0 }
 0x120   : > { %v1263_v0 = vpop.f32.mrf.mxu1  ;;  %v970_v2 = vmax.f32 %v895_v60, 0.0  ;;  %v999_v5 = vpack.c.bf16 %v969_v59, %v967_v54  ;;  %v899_v6 = vadd.f32 %v898_v63, %v3922_v38 }
 0x121   : > { %v1335_v3 = vmax.f32 %v1260_v61, 0.0  ;;  %v900_v7 = vpop.f32.mrf.mxu0  ;;  %v1364_v12 = vpack.c.bf16 %v1334_v62, %v1332_v4  ;;  %v1264_v21 = vadd.f32 %v1263_v0, %v3935_v45 }
 0x122   : > { %v1265_v8 = vpop.f32.mrf.mxu1  ;;  %v1000_v9 = vpack.c.bf16 %v970_v2, %v968_v58  ;;  %v901_v11 = vadd.f32 %v900_v7, %v3928_v40  ;;  %v971_v20 = vmax.f32 %v899_v6, 0.0 }
 0x123   : > { %v1365_v10 = vpack.c.bf16 %v1335_v3, %v1333_v1  ;;  %v902_v13 = vpop.f32.mrf.mxu0  ;;  %v1266_v16 = vadd.f32 %v1265_v8, %v3931_v43  ;;  %v1336_v35 = vmax.f32 %v1264_v21, 0.0 }
 0x124   : > { %v1267_v14 = vpop.f32.mrf.mxu1  ;;  %v903_v17 = vadd.f32 %v902_v13, %v3922_v38  ;;  %1909 = vmatprep.mubr.bf16.mxu1 %v1000_v9  ;;  %v972_v25 = vmax.f32 %v901_v11, 0.0 }
 0x125   : > { %v1268_v18 = vadd.f32 %v1267_v14, %v3935_v45  ;;  %1636 = vmatprep.mubr.bf16.mxu0 %v1365_v10  ;;  %v904_v22 = vpop.f32.mrf.mxu0  ;;  %1910 = vmatmul.mubr.bf16.vlgmr.msra.gmra.mxu1 %v999_v5  ;;  %v1337_v32 = vmax.f32 %v1266_v16, 0.0 }
 0x126   : > { %v1269_v23 = vpop.f32.mrf.mxu1  ;;  %1637 = vmatmul.mubr.bf16.vlgmr.msra.gmra.mxu0 %v1364_v12  ;;  %v973_v26 = vmax.f32 %v903_v17, 0.0  ;;  %v905_v27 = vadd.f32 %v904_v22, %v3928_v40 }
 0x127   : > { %v1270_v28 = vadd.f32 %v1269_v23, %v3931_v43  ;;  %2088 = vmatpush1.msra.mxu0 %v2008_v15  ;;  %v1338_v29 = vmax.f32 %v1268_v18, 0.0  ;;  %v908_v30 = vpop.f32.mrf.mxu0 }
 0x128   : > { %v1273_v31 = vpop.f32.mrf.mxu1  ;;  %2089 = vmatprep.subr.mxu0 %v2007_v19  ;;  %v974_v33 = vmax.f32 %v905_v27, 0.0  ;;  %v1001_v39 = vpack.c.bf16 %v973_v26, %v971_v20  ;;  %v909_v41 = vadd.f32 %v908_v30, %v3922_v38 }
 0x129   : > { %v1339_v34 = vmax.f32 %v1270_v28, 0.0  ;;  %2090 = vmatpush1.msra.mxu0 %v2006_v24  ;;  %v910_v42 = vpop.f32.mrf.mxu0  ;;  %v1366_v49 = vpack.c.bf16 %v1338_v29, %v1336_v35  ;;  %v1274_v56 = vadd.f32 %v1273_v31, %v3935_v45 }
 0x12a   : > { %v1275_v44 = vpop.f32.mrf.mxu1  ;;  %v1002_v46 = vpack.c.bf16 %v974_v33, %v972_v25  ;;  %v911_v48 = vadd.f32 %v910_v42, %v3928_v40  ;;  %v975_v55 = vmax.f32 %v909_v41, 0.0 }
 0x12b   : > { %v1367_v47 = vpack.c.bf16 %v1339_v34, %v1337_v32  ;;  %v912_v50 = vpop.f32.mrf.mxu0  ;;  %v1276_v52 = vadd.f32 %v1275_v44, %v3931_v43  ;;  %v1340_v5 = vmax.f32 %v1274_v56, 0.0 }
 0x12c   : > { %v1277_v51 = vpop.f32.mrf.mxu1  ;;  %v913_v53 = vadd.f32 %v912_v50, %v3922_v38  ;;  %1919 = vmatprep.mubr.bf16.mxu1 %v1002_v46  ;;  %v976_v59 = vmax.f32 %v911_v48, 0.0 }
 0x12d   : > { %v1278_v54 = vadd.f32 %v1277_v51, %v3935_v45  ;;  %1646 = vmatprep.mubr.bf16.mxu0 %v1367_v47  ;;  %v914_v57 = vpop.f32.mrf.mxu0  ;;  %1920 = vmatmul.mubr.bf16.gmra.mxu1 %v1001_v39  ;;  %v1341_v2 = vmax.f32 %v1276_v52, 0.0 }
 0x12e   : > { %v1279_v58 = vpop.f32.mrf.mxu1  ;;  %1647 = vmatmul.mubr.bf16.gmra.mxu0 %v1366_v49  ;;  %v977_v60 = vmax.f32 %v913_v53, 0.0  ;;  %v915_v61 = vadd.f32 %v914_v57, %v3928_v40 }
 0x12f   : > { %v1280_v62 = vadd.f32 %v1279_v58, %v3931_v43  ;;  %v1342_v63 = vmax.f32 %v1278_v54, 0.0  ;;  %v918_v0 = vpop.f32.mrf.mxu0 }
 0x130   : > { %v1283_v1 = vpop.f32.mrf.mxu1  ;;  %v978_v3 = vmax.f32 %v915_v61, 0.0  ;;  %v1003_v6 = vpack.c.bf16 %v977_v60, %v975_v55  ;;  %v919_v7 = vadd.f32 %v918_v0, %v3922_v38 }
 0x131   : > { %v1343_v4 = vmax.f32 %v1280_v62, 0.0  ;;  %v920_v8 = vpop.f32.mrf.mxu0  ;;  %v1368_v13 = vpack.c.bf16 %v1342_v63, %v1340_v5  ;;  %v1284_v20 = vadd.f32 %v1283_v1, %v3935_v45 }
 0x132   : > { %v1285_v9 = vpop.f32.mrf.mxu1  ;;  %v1004_v10 = vpack.c.bf16 %v978_v3, %v976_v59  ;;  %v921_v12 = vadd.f32 %v920_v8, %v3928_v40  ;;  %v979_v19 = vmax.f32 %v919_v7, 0.0 }
 0x133   : > { %v1369_v11 = vpack.c.bf16 %v1343_v4, %v1341_v2  ;;  %v922_v14 = vpop.f32.mrf.mxu0  ;;  %v1286_v16 = vadd.f32 %v1285_v9, %v3931_v43  ;;  %v1344_v33 = vmax.f32 %v1284_v20, 0.0 }
 0x134   : > { %v1287_v15 = vpop.f32.mrf.mxu1  ;;  %v923_v17 = vadd.f32 %v922_v14, %v3922_v38  ;;  %1929 = vmatprep.mubr.bf16.mxu1 %v1004_v10  ;;  %v980_v23 = vmax.f32 %v921_v12, 0.0 }
 0x135   : > { %v1288_v18 = vadd.f32 %v1287_v15, %v3935_v45  ;;  %1656 = vmatprep.mubr.bf16.mxu0 %v1369_v11  ;;  %v924_v21 = vpop.f32.mrf.mxu0  ;;  %1930 = vmatmul.mubr.bf16.gmra.mxu1 %v1003_v6  ;;  %v1345_v30 = vmax.f32 %v1286_v16, 0.0 }
 0x136   : > { %v1289_v22 = vpop.f32.mrf.mxu1  ;;  %1657 = vmatmul.mubr.bf16.gmra.mxu0 %v1368_v13  ;;  %v981_v24 = vmax.f32 %v923_v17, 0.0  ;;  %v925_v25 = vadd.f32 %v924_v21, %v3928_v40 }
 0x137   : > { %v1290_v26 = vadd.f32 %v1289_v22, %v3931_v43  ;;  %v1346_v27 = vmax.f32 %v1288_v18, 0.0  ;;  %v928_v28 = vpop.f32.mrf.mxu0 }
 0x138   : > { %v1293_v29 = vpop.f32.mrf.mxu1  ;;  %v982_v31 = vmax.f32 %v925_v25, 0.0  ;;  %v1005_v34 = vpack.c.bf16 %v981_v24, %v979_v19  ;;  %v929_v35 = vadd.f32 %v928_v28, %v3922_v38 }
 0x139   : > { %v1347_v32 = vmax.f32 %v1290_v26, 0.0  ;;  %v930_v39 = vpop.f32.mrf.mxu0  ;;  %v1370_v47 = vpack.c.bf16 %v1346_v27, %v1344_v33  ;;  %v1294_v54 = vadd.f32 %v1293_v29, %v3935_v45 }
 0x13a   : > { %v1295_v41 = vpop.f32.mrf.mxu1  ;;  %v1006_v42 = vpack.c.bf16 %v982_v31, %v980_v23  ;;  %v931_v46 = vadd.f32 %v930_v39, %v3928_v40  ;;  %v983_v53 = vmax.f32 %v929_v35, 0.0 }
 0x13b   : > { %v1371_v44 = vpack.c.bf16 %v1347_v32, %v1345_v30  ;;  %v932_v48 = vpop.f32.mrf.mxu0  ;;  %v1296_v50 = vadd.f32 %v1295_v41, %v3931_v43  ;;  %v1348_v3 = vmax.f32 %v1294_v54, 0.0 }
 0x13c   : > { %v1297_v49 = vpop.f32.mrf.mxu1  ;;  %v933_v51 = vadd.f32 %v932_v48, %v3922_v38  ;;  %1939 = vmatprep.mubr.bf16.mxu1 %v1006_v42  ;;  %v984_v57 = vmax.f32 %v931_v46, 0.0 }
 0x13d   : > { %v1298_v52 = vadd.f32 %v1297_v49, %v3935_v45  ;;  %1666 = vmatprep.mubr.bf16.mxu0 %v1371_v44  ;;  %v934_v55 = vpop.f32.mrf.mxu0  ;;  %1940 = vmatmul.mubr.bf16.gmra.mxu1 %v1005_v34  ;;  %v1349_v0 = vmax.f32 %v1296_v50, 0.0 }
 0x13e   : > { %v1299_v56 = vpop.f32.mrf.mxu1  ;;  %1667 = vmatmul.mubr.bf16.gmra.mxu0 %v1370_v47  ;;  %v985_v58 = vmax.f32 %v933_v51, 0.0  ;;  %v935_v59 = vadd.f32 %v934_v55, %v3928_v40 }
 0x13f   : > { %v1300_v60 = vadd.f32 %v1299_v56, %v3931_v43  ;;  %v1350_v61 = vmax.f32 %v1298_v52, 0.0  ;;  %v938_v62 = vpop.f32.mrf.mxu0 }
 0x140   : > { %v1303_v63 = vpop.f32.mrf.mxu1  ;;  %v986_v1 = vmax.f32 %v935_v59, 0.0  ;;  %v1007_v4 = vpack.c.bf16 %v985_v58, %v983_v53  ;;  %v939_v5 = vadd.f32 %v938_v62, %v3922_v38 }
 0x141   : > { %v1351_v2 = vmax.f32 %v1300_v60, 0.0  ;;  %v940_v6 = vpop.f32.mrf.mxu0  ;;  %v1372_v11 = vpack.c.bf16 %v1350_v61, %v1348_v3  ;;  %v1304_v18 = vadd.f32 %v1303_v63, %v3935_v45 }
 0x142   : > { %v1305_v7 = vpop.f32.mrf.mxu1  ;;  %v1008_v8 = vpack.c.bf16 %v986_v1, %v984_v57  ;;  %v941_v10 = vadd.f32 %v940_v6, %v3928_v40  ;;  %v987_v17 = vmax.f32 %v939_v5, 0.0 }
 0x143   : > { %v1373_v9 = vpack.c.bf16 %v1351_v2, %v1349_v0  ;;  %v942_v12 = vpop.f32.mrf.mxu0  ;;  %v1306_v14 = vadd.f32 %v1305_v7, %v3931_v43  ;;  %v1352_v31 = vmax.f32 %v1304_v18, 0.0 }
 0x144   : > { %v1307_v13 = vpop.f32.mrf.mxu1  ;;  %v943_v15 = vadd.f32 %v942_v12, %v3922_v38  ;;  %1949 = vmatprep.mubr.bf16.mxu1 %v1008_v8  ;;  %v988_v21 = vmax.f32 %v941_v10, 0.0 }
 0x145   : > { %v1308_v16 = vadd.f32 %v1307_v13, %v3935_v45  ;;  %1676 = vmatprep.mubr.bf16.mxu0 %v1373_v9  ;;  %v944_v19 = vpop.f32.mrf.mxu0  ;;  %1950 = vmatmul.mubr.bf16.gmra.mxu1 %v1007_v4  ;;  %v1353_v28 = vmax.f32 %v1306_v14, 0.0 }
 0x146   : > { %v1309_v20 = vpop.f32.mrf.mxu1  ;;  %1677 = vmatmul.mubr.bf16.gmra.mxu0 %v1372_v11  ;;  %v989_v22 = vmax.f32 %v943_v15, 0.0  ;;  %v945_v23 = vadd.f32 %v944_v19, %v3928_v40 }
 0x147   : > { %v1310_v24 = vadd.f32 %v1309_v20, %v3931_v43  ;;  %v1354_v25 = vmax.f32 %v1308_v16, 0.0  ;;  %v948_v26 = vpop.f32.mrf.mxu0 }
 0x148   : > { %v1313_v27 = vpop.f32.mrf.mxu1  ;;  %v990_v29 = vmax.f32 %v945_v23, 0.0  ;;  %v1009_v32 = vpack.c.bf16 %v989_v22, %v987_v17  ;;  %v949_v33 = vadd.f32 %v948_v26, %v3922_v38 }
 0x149   : > { %v1355_v30 = vmax.f32 %v1310_v24, 0.0  ;;  %v950_v34 = vpop.f32.mrf.mxu0  ;;  %v1374_v44 = vpack.c.bf16 %v1354_v25, %v1352_v31  ;;  %v1314_v52 = vadd.f32 %v1313_v27, %v3935_v45  ;;  %v1992_v31 = vld [vmem:[%s4014_s23 + $0x10] sm:$0xff] }
 0x14a   : > { %v1315_v35 = vpop.f32.mrf.mxu1  ;;  %v1010_v39 = vpack.c.bf16 %v990_v29, %v988_v21  ;;  %v951_v42 = vadd.f32 %v950_v34, %v3928_v40  ;;  %v991_v51 = vmax.f32 %v949_v33, 0.0  ;;  %v1994_v33 = vld [vmem:[%s4014_s23 + $0x20] sm:$0xff]  ;;  %v3223_v34 = vld [vmem:[%s4476_s10 + $0x70] ss:$8 sps:$4 sm:$0xff]  }
 0x14b   : > { %v1375_v41 = vpack.c.bf16 %v1355_v30, %v1353_v28  ;;  %v952_v46 = vpop.f32.mrf.mxu0  ;;  %v1316_v48 = vadd.f32 %v1315_v35, %v3931_v43  ;;  %v1356_v1 = vmax.f32 %v1314_v52, 0.0  ;;  %v3333_v30 = vmov 0.0   ;;  %v3225_v35 = vld [vmem:[%s4476_s10 + $0x74] ss:$8 sps:$4 sm:$0xff]   ;;  %v3235_v52 = vld [vmem:[%s4476_s10 + $0x30] ss:$8 sps:$4 sm:$0xff]  }
 0x14c   : > { %v1317_v47 = vpop.f32.mrf.mxu1  ;;  %v953_v49 = vadd.f32 %v952_v46, %v3922_v38  ;;  %1959 = vmatprep.mubr.bf16.mxu1 %v1010_v39  ;;  %v992_v55 = vmax.f32 %v951_v42, 0.0  ;;  %v1995_v39 = vld [vmem:[%s4014_s23 + $0x28] sm:$0xff]  ;;  %2548 = vmatprep.subr.bf16.mxu1 %v3225_v35  ;;  %v3229_v46 = vld [vmem:[%s4476_s10 + $0x50] ss:$8 sps:$4 sm:$0xff]  }
 0x14d   : > { %v1318_v50 = vadd.f32 %v1317_v47, %v3935_v45  ;;  %1686 = vmatprep.mubr.bf16.mxu0 %v1375_v41  ;;  %v954_v53 = vpop.f32.mrf.mxu0  ;;  %1960 = vmatmul.mubr.bf16.gmra.mxu1 %v1009_v32  ;;  %v1357_v62 = vmax.f32 %v1316_v48, 0.0  ;;  %v1993_v32 = vld [vmem:[%s4014_s23 + $0x18] sm:$0xff]  ;;  %v3226_v41 = vld [vmem:[%s4476_s10 + $0x60] ss:$8 sps:$4 sm:$0xff]   ;;  %v3228_v42 = vld [vmem:[%s4476_s10 + $0x64] ss:$8 sps:$4 sm:$0xff]  }
 0x14e   : > { %v1319_v54 = vpop.f32.mrf.mxu1  ;;  %1687 = vmatmul.mubr.bf16.gmra.mxu0 %v1374_v44  ;;  %v993_v56 = vmax.f32 %v953_v49, 0.0  ;;  %v955_v57 = vadd.f32 %v954_v53, %v3928_v40  ;;  %2549 = vmatpush1.bf16.msra.mxu1 %v3223_v34  ;;  %v1996_v44 = vld [vmem:[%s4014_s23 + $0x30] sm:$0xff]  ;;  %v1997_v48 = vld [vmem:[%s4014_s23 + $0x38] sm:$0xff]  ;;  %v3232_v49 = vld [vmem:[%s4476_s10 + $0x40] ss:$8 sps:$4 sm:$0xff]  }
 0x14f   : > { %v1320_v58 = vadd.f32 %v1319_v54, %v3931_v43  ;;  %v1358_v59 = vmax.f32 %v1318_v50, 0.0  ;;  %v958_v60 = vpop.f32.mrf.mxu0  ;;  %2550 = vmatprep.subr.bf16.mxu1 %v3228_v42  ;;  %v3231_v47 = vld [vmem:[%s4476_s10 + $0x54] ss:$8 sps:$4 sm:$0xff]   ;;  %v3234_v50 = vld [vmem:[%s4476_s10 + $0x44] ss:$8 sps:$4 sm:$0xff]  }
 0x150   : > { %v1323_v61 = vpop.f32.mrf.mxu1  ;;  %v994_v63 = vmax.f32 %v955_v57, 0.0  ;;  %v1011_v2 = vpack.c.bf16 %v993_v56, %v991_v51  ;;  %v959_v3 = vadd.f32 %v958_v60, %v3922_v38  ;;  %v1998_v51 = vld [vmem:[%s4014_s23 + $0x40] sm:$0xff]  ;;  %v3237_v53 = vld [vmem:[%s4476_s10 + $0x34] ss:$8 sps:$4 sm:$0xff]   ;;  %v1999_v54 = vld [vmem:[%s4014_s23 + $0x48] sm:$0xff] }
 0x151   : > { %v1359_v0 = vmax.f32 %v1320_v58, 0.0  ;;  %v960_v4 = vpop.f32.mrf.mxu0  ;;  %v1376_v9 = vpack.c.bf16 %v1358_v59, %v1356_v1  ;;  %v1324_v16 = vadd.f32 %v1323_v61, %v3935_v45  ;;  %v3240_v56 = vld [vmem:[%s4476_s10 + $0x24] ss:$8 sps:$4 sm:$0xff]   ;;  %v2000_v57 = vld [vmem:[%s4014_s23 + $0x50] sm:$0xff]  ;;  %v2001_v60 = vld [vmem:[%s4014_s23 + $0x58] sm:$0xff] }
 0x152   : > { %v1325_v5 = vpop.f32.mrf.mxu1  ;;  %v1012_v6 = vpack.c.bf16 %v994_v63, %v992_v55  ;;  %v961_v8 = vadd.f32 %v960_v4, %v3928_v40  ;;  %v995_v15 = vmax.f32 %v959_v3, 0.0  ;;  %2551 = vmatpush1.bf16.msra.mxu1 %v3226_v41  ;;  %v3238_v55 = vld [vmem:[%s4476_s10 + $0x20] ss:$8 sps:$4 sm:$0xff]   ;;  %v3241_v58 = vld [vmem:[%s4476_s10 + $0x10] ss:$8 sps:$4 sm:$0xff]  }
 0x153   : > { %v1377_v7 = vpack.c.bf16 %v1359_v0, %v1357_v62  ;;  %v962_v10 = vpop.f32.mrf.mxu0  ;;  %v1326_v12 = vadd.f32 %v1325_v5, %v3931_v43  ;;  %v1360_v26 = vmax.f32 %v1324_v16, 0.0  ;;  %2552 = vmatprep.subr.bf16.mxu1 %v3231_v47  ;;  %v3243_v59 = vld [vmem:[%s4476_s10 + $0x14] ss:$8 sps:$4 sm:$0xff]   ;;  %v3244_v61 = vld [vmem:[%s4476_s10] ss:$8 sps:$4 sm:$0xff]  }
 0x154   : > { %v1327_v11 = vpop.f32.mrf.mxu1  ;;  %v963_v13 = vadd.f32 %v962_v10, %v3922_v38  ;;  %1969 = vmatprep.mubr.bf16.mxu1 %v1012_v6  ;;  %v996_v19 = vmax.f32 %v961_v8, 0.0  ;;  %v3246_v62 = vld [vmem:[%s4476_s10 + $0x4] ss:$8 sps:$4 sm:$0xff]   ;;  %v3247_v0 = vld [vmem:[%s4476_s10 + $0xf0] ss:$8 sps:$4 sm:$0xff]  }
 0x155   : > { %v1328_v14 = vadd.f32 %v1327_v11, %v3935_v45  ;;  %1696 = vmatprep.mubr.bf16.mxu0 %v1377_v7  ;;  %v964_v17 = vpop.f32.mrf.mxu0  ;;  %1970 = vmatmul.mubr.bf16.gmra.mxu1 %v1011_v2  ;;  %v1361_v38 = vmax.f32 %v1326_v12, 0.0  ;;  %v2002_v63 = vld [vmem:[%s4014_s23 + $0x60] sm:$0xff]  ;;  %v3249_v1 = vld [vmem:[%s4476_s10 + $0xf4] ss:$8 sps:$4 sm:$0xff]   ;;  %v2003_v2 = vld [vmem:[%s4014_s23 + $0x68] sm:$0xff] }
 0x156   : > { %v1329_v18 = vpop.f32.mrf.mxu1  ;;  %1697 = vmatmul.mubr.bf16.gmra.mxu0 %v1376_v9  ;;  %v997_v20 = vmax.f32 %v963_v13, 0.0  ;;  %v965_v21 = vadd.f32 %v964_v17, %v3928_v40  ;;  %v1990_v40 = vld [vmem:[%s4014_s23] sm:$0xff]  ;;  %2553 = vmatpush1.bf16.msra.mxu1 %v3229_v46  ;;  %v2004_v5 = vld [vmem:[%s4014_s23 + $0x70] sm:$0xff]  ;;  %v2005_v8 = vld [vmem:[%s4014_s23 + $0x78] sm:$0xff] }
 0x157   : > { %v1330_v22 = vadd.f32 %v1329_v18, %v3931_v43  ;;  %v1362_v23 = vmax.f32 %v1328_v14, 0.0  ;;  %v1991_v43 = vld [vmem:[%s4014_s23 + $0x8] sm:$0xff]  ;;  %2554 = vmatprep.subr.bf16.mxu1 %v3234_v50  ;;  %v3253_v6 = vld [vmem:[%s4476_s10 + $0xd0] ss:$8 sps:$4 sm:$0xff]   ;;  %v3255_v7 = vld [vmem:[%s4476_s10 + $0xd4] ss:$8 sps:$4 sm:$0xff]  }
 0x158   : > { %v998_v24 = vmax.f32 %v965_v21, 0.0  ;;  %v1013_v27 = vpack.c.bf16 %v997_v20, %v995_v15  ;;  %v3250_v3 = vld [vmem:[%s4476_s10 + $0xe0] ss:$8 sps:$4 sm:$0xff]   ;;  %v3252_v4 = vld [vmem:[%s4476_s10 + $0xe4] ss:$8 sps:$4 sm:$0xff]  }
 0x159   : > { %v1363_v25 = vmax.f32 %v1330_v22, 0.0  ;;  %v1378_v45 = vpack.c.bf16 %v1362_v23, %v1360_v26  ;;  %v3256_v9 = vld [vmem:[%s4476_s10 + $0xc0] ss:$8 sps:$4 sm:$0xff]   ;;  %v3258_v10 = vld [vmem:[%s4476_s10 + $0xc4] ss:$8 sps:$4 sm:$0xff]  }
 0x15a   : > { %v1014_v28 = vpack.c.bf16 %v998_v24, %v996_v19  ;;  %2555 = vmatpush1.bf16.msra.mxu1 %v3232_v49  ;;  %v3259_v11 = vld [vmem:[%s4476_s10 + $0xb0] ss:$8 sps:$4 sm:$0xff]   ;;  %v3261_v12 = vld [vmem:[%s4476_s10 + $0xb4] ss:$8 sps:$4 sm:$0xff]   ;;  %v3264_v13 = vld [vmem:[%s4476_s10 + $0xa4] ss:$8 sps:$4 sm:$0xff]  }
 0x15b   : > { %v1379_v29 = vpack.c.bf16 %v1363_v25, %v1361_v38  ;;  %2556 = vmatprep.subr.bf16.mxu1 %v3237_v53  ;;  %v3262_v14 = vld [vmem:[%s4476_s10 + $0xa0] ss:$8 sps:$4 sm:$0xff]   ;;  %v3267_v15 = vld [vmem:[%s4476_s10 + $0x94] ss:$8 sps:$4 sm:$0xff]   ;;  %v3265_v16 = vld [vmem:[%s4476_s10 + $0x90] ss:$8 sps:$4 sm:$0xff]  }
 0x15c   : > { %1979 = vmatprep.mubr.bf16.mxu1 %v1014_v28  ;;  %v3270_v17 = vld [vmem:[%s4476_s10 + $0x84] ss:$8 sps:$4 sm:$0xff]   ;;  %v3268_v18 = vld [vmem:[%s4476_s10 + $0x80] ss:$8 sps:$4 sm:$0xff]  }
 0x15d   : > { %1706 = vmatprep.mubr.bf16.mxu0 %v1379_v29  ;;  %1980 = vmatmul.mubr.bf16.gmra.mxu1 %v1013_v27 }
 0x15e   : > { %1707 = vmatmul.mubr.bf16.gmra.mxu0 %v1378_v45  ;;  %2557 = vmatpush1.bf16.msra.mxu1 %v3235_v52 }
 0x15f   : > { %2123 = vmatprep.mubr.f32.mxu0 %v3333_v30  ;;  %2558 = vmatprep.subr.bf16.mxu1 %v3240_v56 }
 0x162   : > { %2559 = vmatpush1.bf16.msra.mxu1 %v3238_v55 }
 0x163   : > { %2560 = vmatprep.subr.bf16.mxu1 %v3243_v59 }
 0x166   : > { %2927 = vmatmul.mubr.msk.f32.vlgmr.msra.gmra.mxu0 %vm2010_vm0, %v1990_v40  ;;  %2561 = vmatpush1.bf16.msra.mxu1 %v3241_v58 }
 0x167   : > { %2129 = vmatprep.mubr.f32.mxu0 %v3333_v30  ;;  %2562 = vmatprep.subr.bf16.mxu1 %v3246_v62 }
 0x16a   : > { %2928 = vmatmul.mubr.msk.f32.gmra.mxu0 %vm2010_vm0, %v1991_v43  ;;  %2563 = vmatpush1.bf16.msra.mxu1 %v3244_v61 }
 0x16b   : > { %2135 = vmatprep.mubr.f32.mxu0 %v3333_v30  ;;  %2564 = vmatprep.subr.bf16.mxu1 %v3249_v1 }
 0x16e   : > { %2929 = vmatmul.mubr.msk.f32.gmra.mxu0 %vm2010_vm0, %v1992_v31  ;;  %2565 = vmatpush2.bf16.msra.mxu1 %v3247_v0 }
 0x16f   : > { %2141 = vmatprep.mubr.f32.mxu0 %v3333_v30  ;;  %2566 = vmatprep.subr.bf16.mxu1 %v3252_v4 }
 0x172   : > { %2930 = vmatmul.mubr.msk.f32.gmra.mxu0 %vm2010_vm0, %v1993_v32  ;;  %2567 = vmatpush2.bf16.msra.mxu1 %v3250_v3 }
 0x173   : > { %2147 = vmatprep.mubr.f32.mxu0 %v3333_v30  ;;  %2568 = vmatprep.subr.bf16.mxu1 %v3255_v7 }
 0x176   : > { %2931 = vmatmul.mubr.msk.f32.gmra.mxu0 %vm2010_vm0, %v1994_v33  ;;  %2569 = vmatpush2.bf16.msra.mxu1 %v3253_v6  ;;  %v2252_v6 = vld [vmem:[%s4475_s9] sm:$0x3] }
 0x177   : > { %2153 = vmatprep.mubr.f32.mxu0 %v3333_v30  ;;  %2570 = vmatprep.subr.bf16.mxu1 %v3258_v10 }
 0x17a   : > { %2932 = vmatmul.mubr.msk.f32.gmra.mxu0 %vm2010_vm0, %v1995_v39  ;;  %2571 = vmatpush2.bf16.msra.mxu1 %v3256_v9 }
 0x17b   : > { %2159 = vmatprep.mubr.f32.mxu0 %v3333_v30  ;;  %2572 = vmatprep.subr.bf16.mxu1 %v3261_v12 }
 0x17e   : > { %2933 = vmatmul.mubr.msk.f32.gmra.mxu0 %vm2010_vm0, %v1996_v44  ;;  %2573 = vmatpush2.bf16.msra.mxu1 %v3259_v11  ;;  %v4235_v11 = vrot.slane %v2252_v6, %v3917_v36 }
 0x17f   : > { %2165 = vmatprep.mubr.f32.mxu0 %v3333_v30  ;;  %2574 = vmatprep.subr.bf16.mxu1 %v3264_v13 }
 0x182   : > { %2934 = vmatmul.mubr.msk.f32.gmra.mxu0 %vm2010_vm0, %v1997_v48  ;;  %2575 = vmatpush2.bf16.msra.mxu1 %v3262_v14 }
 0x183   : > { %2171 = vmatprep.mubr.f32.mxu0 %v3333_v30  ;;  %2576 = vmatprep.subr.bf16.mxu1 %v3267_v15 }
 0x186   : > { %2935 = vmatmul.mubr.msk.f32.gmra.mxu0 %vm2010_vm0, %v1998_v51  ;;  %2577 = vmatpush2.bf16.msra.mxu1 %v3265_v16  ;;  %v4240_v16 = vrot.slane %v2252_v6, %v3919_v37 }
 0x187   : > { %2177 = vmatprep.mubr.f32.mxu0 %v3333_v30  ;;  %2578 = vmatprep.subr.bf16.mxu1 %v3270_v17 }
 0x18a   : > { %2936 = vmatmul.mubr.msk.f32.gmra.mxu0 %vm2010_vm0, %v1999_v54  ;;  %2579 = vmatpush2.bf16.msra.mxu1 %v3268_v18 }
 0x18b   : > { %2183 = vmatprep.mubr.f32.mxu0 %v3333_v30 }
 0x18e   : > { %2937 = vmatmul.mubr.msk.f32.gmra.mxu0 %vm2010_vm0, %v2000_v57 }
 0x18f   : > { %2189 = vmatprep.mubr.f32.mxu0 %v3333_v30 }
 0x192   : > { %2938 = vmatmul.mubr.msk.f32.gmra.mxu0 %vm2010_vm0, %v2001_v60 }
 0x193   : > { %2195 = vmatprep.mubr.f32.mxu0 %v3333_v30 }
 0x196   : > { %2939 = vmatmul.mubr.msk.f32.gmra.mxu0 %vm2010_vm0, %v2002_v63 }
 0x197   : > { %2201 = vmatprep.mubr.f32.mxu0 %v3333_v30 }
 0x19a   : > { %2940 = vmatmul.mubr.msk.f32.gmra.mxu0 %vm2010_vm0, %v2003_v2 }
 0x19b   : > { %2207 = vmatprep.mubr.f32.mxu0 %v3333_v30 }
 0x19e   : > { %2941 = vmatmul.mubr.msk.f32.gmra.mxu0 %vm2010_vm0, %v2004_v5 }
 0x19f   : > { %2213 = vmatprep.mubr.f32.mxu0 %v3333_v30 }
 0x1a2   : > { %2942 = vmatmul.mubr.msk.f32.gmra.mxu0 %vm2010_vm0, %v2005_v8 }
 0x1e5   : > { %v1911_v20 = vpop.f32.mrf.mxu1 }
 0x1e6   : > { %v1638_v19 = vpop.f32.mrf.mxu0 }
 0x1e7   : > { %v1913_v22 = vpop.f32.mrf.mxu1  ;;  %v1912_v7 = vadd.f32 %v1911_v20, %v1638_v19 }
 0x1e8   : > { %v1640_v21 = vpop.f32.mrf.mxu0 }
 0x1e9   : > { %v1915_v38 = vpop.f32.mrf.mxu1  ;;  %v1914_v9 = vadd.f32 %v1913_v22, %v1640_v21 }
 0x1ea   : > { %v1642_v23 = vpop.f32.mrf.mxu0 }
 0x1eb   : > { %v1917_v26 = vpop.f32.mrf.mxu1  ;;  %v1916_v14 = vadd.f32 %v1915_v38, %v1642_v23 }
 0x1ec   : > { %v1644_v24 = vpop.f32.mrf.mxu0 }
 0x1ed   : > { %v1921_v29 = vpop.f32.mrf.mxu1  ;;  %v1918_v18 = vadd.f32 %v1917_v26, %v1644_v24 }
 0x1ee   : > { %v1648_v25 = vpop.f32.mrf.mxu0 }
 0x1ef   : > { %v1923_v40 = vpop.f32.mrf.mxu1  ;;  %v1922_v21 = vadd.f32 %v1921_v29, %v1648_v25 }
 0x1f0   : > { %v1650_v27 = vpop.f32.mrf.mxu0 }
 0x1f1   : > { %v1925_v32 = vpop.f32.mrf.mxu1  ;;  %v1924_v36 = vadd.f32 %v1923_v40, %v1650_v27 }
 0x1f2   : > { %v4159_v28 = vpop.f32.mrf.mxu0 }
 0x1f3   : > { %v4173_v35 = vpop.f32.mrf.mxu1  ;;  %v1926_v24 = vadd.f32 %v1925_v32, %v4159_v28 }
 0x1f4   : > { %v4161_v45 = vpop.f32.mrf.mxu0 }
 0x1f5   : > { %v4179_v42 = vpop.f32.mrf.mxu1 }
 0x1f6   : > { %v4163_v30 = vpop.f32.mrf.mxu0 }
 0x1f7   : > { %v4185_v47 = vpop.f32.mrf.mxu1  ;;  %v1932_v28 = vadd.f32 %v4179_v42, %v4163_v30 }
 0x1f8   : > { %v4165_v43 = vpop.f32.mrf.mxu0 }
 0x1f9   : > { %v4191_v50 = vpop.f32.mrf.mxu1 }
 0x1fa   : > { %v4167_v31 = vpop.f32.mrf.mxu0 }
 0x1fb   : > { %v4197_v53 = vpop.f32.mrf.mxu1 }
 0x1fc   : > { %v4169_v33 = vpop.f32.mrf.mxu0 }
 0x1fd   : > { %v4203_v56 = vpop.f32.mrf.mxu1 }
 0x1fe   : > { %v4171_v34 = vpop.f32.mrf.mxu0 }
 0x1ff   : > { %v4209_v59 = vpop.f32.mrf.mxu1 }
 0x200   : > { %v4175_v39 = vpop.f32.mrf.mxu0 }
 0x201   : > { %v4215_v62 = vpop.f32.mrf.mxu1 }
 0x202   : > { %v4177_v41 = vpop.f32.mrf.mxu0 }
 0x203   : > { %v4221_v1 = vpop.f32.mrf.mxu1 }
 0x204   : > { %v4181_v44 = vpop.f32.mrf.mxu0 }
 0x205   : > { %v4227_v4 = vpop.f32.mrf.mxu1 }
 0x206   : > { %v4183_v46 = vpop.f32.mrf.mxu0 }
 0x207   : > { %v4237_v12 = vpop.f32.mrf.mxu1 }
 0x208   : > { %v4187_v48 = vpop.f32.mrf.mxu0 }
 0x209   : > { %v4243_v19 = vpop.f32.mrf.mxu1 }
 0x20a   : > { %v4189_v49 = vpop.f32.mrf.mxu0 }
 0x20b   : > { %v4249_v26 = vpop.f32.mrf.mxu1 }
 0x20c   : > { %v4193_v51 = vpop.f32.mrf.mxu0 }
 0x20e   : > { %v4195_v52 = vpop.f32.mrf.mxu0 }
 0x210   : > { %v4199_v54 = vpop.f32.mrf.mxu0 }
 0x212   : > { %v4201_v55 = vpop.f32.mrf.mxu0 }
 0x214   : > { %v4205_v57 = vpop.f32.mrf.mxu0 }
 0x216   : > { %v4207_v58 = vpop.f32.mrf.mxu0 }
 0x218   : > { %v4211_v60 = vpop.f32.mrf.mxu0 }
 0x21a   : > { %v4213_v61 = vpop.f32.mrf.mxu0 }
 0x21c   : > { %v4217_v63 = vpop.f32.mrf.mxu0 }
 0x21e   : > { %v4219_v0 = vpop.f32.mrf.mxu0 }
 0x220   : > { %v4223_v2 = vpop.f32.mrf.mxu0 }
 0x222   : > { %v4225_v3 = vpop.f32.mrf.mxu0 }
 0x223   : > { %4491 = vst [vmem:[#allocation10_spill] sm:$0xff] %v4225_v3 }
 0x224   : > { %v4229_v5 = vpop.f32.mrf.mxu0 }
 0x225   : > { %4492 = vst [vmem:[#allocation11_spill] sm:$0xff] %v4229_v5 }
 0x226   : > { %v2125_v8 = vpop.f32.mrf.mxu0 }
 0x227   : > { %v2220_v10 = vadd.f32 %v2125_v8, %v1912_v7 }
 0x228   : > { %v2127_v13 = vpop.f32.mrf.mxu0 }
 0x229   : > { %v2221_v15 = vadd.f32 %v2127_v13, %v1914_v9  ;;  %v2264_v5 = vadd.f32 %v4235_v11, %v2220_v10 }
 0x22a   : > { %v2131_v17 = vpop.f32.mrf.mxu0 }
 0x22b   : > { %v2222_v3 = vadd.f32 %v2131_v17, %v1916_v14  ;;  %v2265_v22 = vadd.f32 %v4240_v16, %v2221_v15  ;;  %v2296_v38 = vmax.f32 %v2264_v5, 0.0 }
 0x22c   : > { %v2133_v20 = vpop.f32.mrf.mxu0 }
 0x22d   : > { %v2266_v7 = vadd.f32 %v4235_v11, %v2222_v3  ;;  %v2223_v8 = vadd.f32 %v2133_v20, %v1918_v18  ;;  %v2297_v14 = vmax.f32 %v2265_v22, 0.0  ;;  %v1928_v3 = vadd.f32 %v4173_v35, %v4161_v45  ;;  %v4254_v18 = vpop.f32.mrf.mxu1 }
 0x22e   : > { %v2137_v23 = vpop.f32.mrf.mxu0 }
 0x22f   : > { %v2298_v9 = vmax.f32 %v2266_v7, 0.0  ;;  %v2267_v6 = vadd.f32 %v4240_v16, %v2223_v8  ;;  %v2224_v13 = vadd.f32 %v2137_v23, %v1922_v21  ;;  %v4265_v30 = vpop.f32.mrf.mxu1 }
 0x230   : > { %v2139_v10 = vpop.f32.mrf.mxu0 }
 0x231   : > { %v2328_v17 = vpack.c.bf16 %v2298_v9, %v2296_v38  ;;  %v2299_v25 = vmax.f32 %v2267_v6, 0.0  ;;  %v2225_v29 = vadd.f32 %v2139_v10, %v1924_v36  ;;  %v2268_v27 = vadd.f32 %v4235_v11, %v2224_v13 }
 0x232   : > { %v2143_v15 = vpop.f32.mrf.mxu0  ;;  %v1934_v36 = vadd.f32 %v4185_v47, %v4165_v43  ;;  %v1936_v38 = vadd.f32 %v4191_v50, %v4167_v31  ;;  %v1938_v43 = vadd.f32 %v4197_v53, %v4169_v33  ;;  %v1942_v31 = vadd.f32 %v4203_v56, %v4171_v34 }
 0x233   : > { %v2226_v40 = vadd.f32 %v2143_v15, %v1926_v24  ;;  %v2329_v5 = vpack.c.bf16 %v2299_v25, %v2297_v14  ;;  %v2269_v32 = vadd.f32 %v4240_v16, %v2225_v29  ;;  %v2300_v35 = vmax.f32 %v2268_v27, 0.0  ;;  %v4270_v25 = vpop.f32.mrf.mxu1 }
 0x234   : > { %v2145_v20 = vpop.f32.mrf.mxu0  ;;  %v1944_v27 = vadd.f32 %v4209_v59, %v4175_v39  ;;  %v1948_v39 = vadd.f32 %v4221_v1, %v4181_v44 }
 0x235   : > { %v2270_v21 = vadd.f32 %v4235_v11, %v2226_v40  ;;  %v2227_v22 = vadd.f32 %v2145_v20, %v1928_v3  ;;  %2580 = vmatprep.mubr.bf16.mxu1 %v2329_v5  ;;  %v2301_v9 = vmax.f32 %v2269_v32, 0.0  ;;  %v1967_v34 = vpop.f32.mrf.mxu1 }
 0x236   : > { %v2149_v45 = vpop.f32.mrf.mxu0  ;;  %2581 = vmatmul.mubr.bf16.vlgmr.msra.gmra.mxu1 %v2328_v17 }
 0x237   : > { %v2302_v7 = vmax.f32 %v2270_v21, 0.0  ;;  %v2271_v8 = vadd.f32 %v4240_v16, %v2227_v22  ;;  %v2228_v23 = vadd.f32 %v2149_v45, %v1932_v28  ;;  %v1946_v28 = vadd.f32 %v4215_v62, %v4177_v41 }
 0x238   : > { %v2151_v42 = vpop.f32.mrf.mxu0 }
 0x239   : > { %v2303_v6 = vmax.f32 %v2271_v8, 0.0  ;;  %v2229_v13 = vadd.f32 %v2151_v42, %v1934_v36  ;;  %v2330_v24 = vpack.c.bf16 %v2302_v7, %v2300_v35  ;;  %v2272_v47 = vadd.f32 %v4235_v11, %v2228_v23  ;;  %v1971_v8 = vpop.f32.mrf.mxu1 }
 0x23a   : > { %v2155_v10 = vpop.f32.mrf.mxu0 }
 0x23b   : > { %v2230_v14 = vadd.f32 %v2155_v10, %v1936_v38  ;;  %v2331_v17 = vpack.c.bf16 %v2303_v6, %v2301_v9  ;;  %v2273_v50 = vadd.f32 %v4240_v16, %v2229_v13  ;;  %v2304_v53 = vmax.f32 %v2272_v47, 0.0 }
 0x23c   : > { %v2157_v29 = vpop.f32.mrf.mxu0  ;;  %v1952_v38 = vadd.f32 %v4227_v4, %v4183_v46  ;;  %v1954_v9 = vadd.f32 %v4237_v12, %v4187_v48  ;;  %v1956_v10 = vadd.f32 %v4243_v19, %v4189_v49  ;;  %v1973_v46 = vpop.f32.mrf.mxu1  ;;  %v1958_v48 = vadd.f32 %v4249_v26, %v4193_v51 }
 0x23d   : > { %v2274_v15 = vadd.f32 %v4235_v11, %v2230_v14  ;;  %v2231_v3 = vadd.f32 %v2157_v29, %v1938_v43  ;;  %2590 = vmatprep.mubr.bf16.mxu1 %v2331_v17  ;;  %v2305_v32 = vmax.f32 %v2273_v50, 0.0 }
 0x23e   : > { %v2161_v33 = vpop.f32.mrf.mxu0  ;;  %2591 = vmatmul.mubr.bf16.gmra.mxu1 %v2330_v24 }
 0x23f   : > { %v2306_v40 = vmax.f32 %v2274_v15, 0.0  ;;  %v2275_v5 = vadd.f32 %v4240_v16, %v2231_v3  ;;  %v2232_v20 = vadd.f32 %v2161_v33, %v1942_v31  ;;  %v1975_v15 = vpop.f32.mrf.mxu1 }
 0x240   : > { %v2163_v56 = vpop.f32.mrf.mxu0 }
 0x241   : > { %v2307_v21 = vmax.f32 %v2275_v5, 0.0  ;;  %v2233_v22 = vadd.f32 %v2163_v56, %v1944_v27  ;;  %v2332_v36 = vpack.c.bf16 %v2306_v40, %v2304_v53  ;;  %v2276_v59 = vadd.f32 %v4235_v11, %v2232_v20 }
 0x242   : > { %v2167_v45 = vpop.f32.mrf.mxu0  ;;  %v1962_v27 = vadd.f32 %v4254_v18, %v4195_v52  ;;  %v1964_v53 = vadd.f32 %v4265_v30, %v4199_v54  ;;  %v1977_v52 = vpop.f32.mrf.mxu1 }
 0x243   : > { %v2234_v35 = vadd.f32 %v2167_v45, %v1946_v28  ;;  %v2333_v7 = vpack.c.bf16 %v2307_v21, %v2305_v32  ;;  %v2277_v41 = vadd.f32 %v4240_v16, %v2233_v22  ;;  %v2308_v44 = vmax.f32 %v2276_v59, 0.0 }
 0x244   : > { %v2169_v23 = vpop.f32.mrf.mxu0  ;;  %v1966_v28 = vadd.f32 %v4270_v25, %v4201_v55  ;;  %v1968_v45 = vadd.f32 %v1967_v34, %v4205_v57  ;;  %v1981_v59 = vpop.f32.mrf.mxu1 }
 0x245   : > { %v2278_v62 = vadd.f32 %v4235_v11, %v2234_v35  ;;  %v2235_v42 = vadd.f32 %v2169_v23, %v1948_v39  ;;  %2600 = vmatprep.mubr.bf16.mxu1 %v2333_v7  ;;  %v2309_v43 = vmax.f32 %v2277_v41, 0.0  ;;  %v1972_v7 = vadd.f32 %v1971_v8, %v4207_v58 }
 0x246   : > { %v2173_v6 = vpop.f32.mrf.mxu0  ;;  %2601 = vmatmul.mubr.bf16.gmra.mxu1 %v2332_v36 }
 0x247   : > { %v2310_v1 = vmax.f32 %v2278_v62, 0.0  ;;  %v2279_v13 = vadd.f32 %v4240_v16, %v2235_v42  ;;  %v2236_v24 = vadd.f32 %v2173_v6, %v1952_v38  ;;  %v1974_v38 = vadd.f32 %v1973_v46, %v4211_v60  ;;  %v1983_v6 = vpop.f32.mrf.mxu1 }
 0x248   : > { %v2175_v4 = vpop.f32.mrf.mxu0 }
 0x249   : > { %v2311_v47 = vmax.f32 %v2279_v13, 0.0  ;;  %v2237_v14 = vadd.f32 %v2175_v4, %v1954_v9  ;;  %v2334_v17 = vpack.c.bf16 %v2310_v1, %v2308_v44  ;;  %v2280_v12 = vadd.f32 %v4235_v11, %v2236_v24 }
 0x24a   : > { %v2179_v29 = vpop.f32.mrf.mxu0  ;;  %v1976_v9 = vadd.f32 %v1975_v15, %v4213_v61 }
 0x24b   : > { %v2238_v31 = vadd.f32 %v2179_v29, %v1956_v10  ;;  %v2335_v50 = vpack.c.bf16 %v2311_v47, %v2309_v43  ;;  %v2281_v49 = vadd.f32 %v4240_v16, %v2237_v14  ;;  %v2312_v51 = vmax.f32 %v2280_v12, 0.0  ;;  %v1985_v43 = vpop.f32.mrf.mxu1 }
 0x24c   : > { %v2181_v3 = vpop.f32.mrf.mxu0  ;;  %v1978_v10 = vadd.f32 %v1977_v52, %v4217_v63  ;;  %v1982_v14 = vadd.f32 %v1981_v59, %v4219_v0  ;;  %v2376_v59 = vld [vmem:[%s4477_s11] sm:$0x3] }
 0x24d   : > { %v2282_v19 = vadd.f32 %v4235_v11, %v2238_v31  ;;  %v2239_v33 = vadd.f32 %v2181_v3, %v1958_v48  ;;  %2610 = vmatprep.mubr.bf16.mxu1 %v2335_v50  ;;  %v2313_v56 = vmax.f32 %v2281_v49, 0.0  ;;  %v1984_v48 = vadd.f32 %v1983_v6, %v4223_v2  ;;  %v4493_v3 = vld [vmem:[#allocation10_spill] sm:$0xff]  ;;  %v1987_v49 = vpop.f32.mrf.mxu1 }
 0x24e   : > { %v2185_v40 = vpop.f32.mrf.mxu0  ;;  %2611 = vmatmul.mubr.bf16.gmra.mxu1 %v2334_v17 }
 0x24f   : > { %v2314_v26 = vmax.f32 %v2282_v19, 0.0  ;;  %v2283_v5 = vadd.f32 %v4240_v16, %v2239_v33  ;;  %v2240_v20 = vadd.f32 %v2185_v40, %v1962_v27  ;;  %v1986_v27 = vadd.f32 %v1985_v43, %v4493_v3 }
 0x250   : > { %v2187_v18 = vpop.f32.mrf.mxu0 }
 0x251   : > { %v2315_v32 = vmax.f32 %v2283_v5, 0.0  ;;  %v2241_v21 = vadd.f32 %v2187_v18, %v1964_v53  ;;  %v2336_v22 = vpack.c.bf16 %v2314_v26, %v2312_v51  ;;  %v2284_v54 = vadd.f32 %v4235_v11, %v2240_v20  ;;  %v4494_v26 = vld [vmem:[#allocation11_spill] sm:$0xff] }
 0x252   : > { %v2191_v36 = vpop.f32.mrf.mxu0  ;;  %v1988_v5 = vadd.f32 %v1987_v49, %v4494_v26 }
 0x253   : > { %v2242_v30 = vadd.f32 %v2191_v36, %v1966_v28  ;;  %v2337_v39 = vpack.c.bf16 %v2315_v32, %v2313_v56  ;;  %v2285_v23 = vadd.f32 %v4240_v16, %v2241_v21  ;;  %v2316_v62 = vmax.f32 %v2284_v54, 0.0 }
 0x254   : > { %v2193_v35 = vpop.f32.mrf.mxu0 }
 0x255   : > { %v2286_v55 = vadd.f32 %v4235_v11, %v2242_v30  ;;  %v2243_v25 = vadd.f32 %v2193_v35, %v1968_v45  ;;  %2620 = vmatprep.mubr.bf16.mxu1 %v2337_v39  ;;  %v2317_v58 = vmax.f32 %v2285_v23, 0.0 }
 0x256   : > { %v2197_v41 = vpop.f32.mrf.mxu0  ;;  %2621 = vmatmul.mubr.bf16.gmra.mxu1 %v2336_v22 }
 0x257   : > { %v2318_v57 = vmax.f32 %v2286_v55, 0.0  ;;  %v2287_v34 = vadd.f32 %v4240_v16, %v2243_v25  ;;  %v2244_v42 = vadd.f32 %v2197_v41, %v1972_v7  ;;  %v4336_v7 = vrot.slane %v2376_v59, %v3919_v37 }
 0x258   : > { %v2199_v44 = vpop.f32.mrf.mxu0 }
 0x259   : > { %v2319_v8 = vmax.f32 %v2287_v34, 0.0  ;;  %v2245_v1 = vadd.f32 %v2199_v44, %v1974_v38  ;;  %v2338_v13 = vpack.c.bf16 %v2318_v57, %v2316_v62  ;;  %v2288_v60 = vadd.f32 %v4235_v11, %v2244_v42 }
 0x25a   : > { %v2203_v24 = vpop.f32.mrf.mxu0 }
 0x25b   : > { %v2246_v46 = vadd.f32 %v2203_v24, %v1976_v9  ;;  %v2339_v4 = vpack.c.bf16 %v2319_v8, %v2317_v58  ;;  %v2289_v17 = vadd.f32 %v4240_v16, %v2245_v1  ;;  %v2320_v31 = vmax.f32 %v2288_v60, 0.0 }
 0x25c   : > { %v2205_v47 = vpop.f32.mrf.mxu0 }
 0x25d   : > { %v2290_v61 = vadd.f32 %v4235_v11, %v2246_v46  ;;  %v2247_v29 = vadd.f32 %v2205_v47, %v1978_v10  ;;  %2630 = vmatprep.mubr.bf16.mxu1 %v2339_v4  ;;  %v2321_v0 = vmax.f32 %v2289_v17, 0.0 }
 0x25e   : > { %v2209_v12 = vpop.f32.mrf.mxu0  ;;  %2631 = vmatmul.mubr.bf16.gmra.mxu1 %v2338_v13 }
 0x25f   : > { %v2322_v63 = vmax.f32 %v2290_v61, 0.0  ;;  %v2291_v50 = vadd.f32 %v4240_v16, %v2247_v29  ;;  %v2248_v15 = vadd.f32 %v2209_v12, %v1982_v14 }
 0x260   : > { %v2211_v19 = vpop.f32.mrf.mxu0 }
 0x261   : > { %v2323_v33 = vmax.f32 %v2291_v50, 0.0  ;;  %v2249_v53 = vadd.f32 %v2211_v19, %v1984_v48  ;;  %v2340_v40 = vpack.c.bf16 %v2322_v63, %v2320_v31  ;;  %v2292_v2 = vadd.f32 %v4235_v11, %v2248_v15 }
 0x262   : > { %v2215_v51 = vpop.f32.mrf.mxu0 }
 0x263   : > { %v2250_v20 = vadd.f32 %v2215_v51, %v1986_v27  ;;  %v2341_v28 = vpack.c.bf16 %v2323_v33, %v2321_v0  ;;  %v2293_v18 = vadd.f32 %v4240_v16, %v2249_v53  ;;  %v2324_v21 = vmax.f32 %v2292_v2, 0.0 }
 0x264   : > { %v2217_v52 = vpop.f32.mrf.mxu0 }
 0x265   : > { %v2294_v56 = vadd.f32 %v4235_v11, %v2250_v20  ;;  %v2251_v32 = vadd.f32 %v2217_v52, %v1988_v5  ;;  %2640 = vmatprep.mubr.bf16.mxu1 %v2341_v28  ;;  %v2325_v45 = vmax.f32 %v2293_v18, 0.0  ;;  %v4495_v11 = vld [vmem:[#allocation9_spill] sm:$0xff] }
 0x266   : > { %2641 = vmatmul.mubr.bf16.gmra.mxu1 %v2340_v40  ;;  %v4333_v35 = vrot.slane %v2376_v59, %v4495_v11 }
 0x267   : > { %v2326_v22 = vmax.f32 %v2294_v56, 0.0  ;;  %v2295_v36 = vadd.f32 %v4240_v16, %v2251_v32 }
 0x269   : > { %v2327_v54 = vmax.f32 %v2295_v36, 0.0  ;;  %v2342_v30 = vpack.c.bf16 %v2326_v22, %v2324_v21 }
 0x26b   : > { %v2343_v39 = vpack.c.bf16 %v2327_v54, %v2325_v45 }
 0x26d   : > { %2650 = vmatprep.mubr.bf16.mxu1 %v2343_v39 }
 0x26e   : > { %2651 = vmatmul.mubr.bf16.gmra.mxu1 %v2342_v30 }
 0x2f6   : > { %v2582_v16 = vpop.f32.mrf.mxu1 }
 0x2f7   : > { %v2583_v23 = vadd.f32 %v2582_v16, %v4333_v35 }
 0x2f8   : > { %v2584_v55 = vpop.f32.mrf.mxu1 }
 0x2f9   : > { %2661 = vst [vmem:[%s4339_s27] sm:$0xff] %v2583_v23  ;;  %v2585_v25 = vadd.f32 %v2584_v55, %v4336_v7 }
 0x2fa   : > { %v2586_v38 = vpop.f32.mrf.mxu1 }
 0x2fb   : > { %2662 = vst [vmem:[%s4339_s27 + $0x8] sm:$0xff] %v2585_v25  ;;  %v2587_v37 = vadd.f32 %v2586_v38, %v4333_v35 }
 0x2fc   : > { %v2588_v41 = vpop.f32.mrf.mxu1 }
 0x2fd   : > { %2663 = vst [vmem:[%s4339_s27 + $0x10] sm:$0xff] %v2587_v37  ;;  %v2589_v62 = vadd.f32 %v2588_v41, %v4336_v7 }
 0x2fe   : > { %v2592_v57 = vpop.f32.mrf.mxu1 }
 0x2ff   : > { %2664 = vst [vmem:[%s4339_s27 + $0x18] sm:$0xff] %v2589_v62  ;;  %v2593_v34 = vadd.f32 %v2592_v57, %v4333_v35 }
 0x300   : > { %v2594_v42 = vpop.f32.mrf.mxu1 }
 0x301   : > { %2665 = vst [vmem:[%s4339_s27 + $0x20] sm:$0xff] %v2593_v34  ;;  %v2595_v9 = vadd.f32 %v2594_v42, %v4336_v7 }
 0x302   : > { %v2596_v6 = vpop.f32.mrf.mxu1 }
 0x303   : > { %2666 = vst [vmem:[%s4339_s27 + $0x28] sm:$0xff] %v2595_v9  ;;  %v2597_v44 = vadd.f32 %v2596_v6, %v4333_v35 }
 0x304   : > { %v2598_v58 = vpop.f32.mrf.mxu1 }
 0x305   : > { %2667 = vst [vmem:[%s4339_s27 + $0x30] sm:$0xff] %v2597_v44  ;;  %v2599_v8 = vadd.f32 %v2598_v58, %v4336_v7 }
 0x306   : > { %v2602_v1 = vpop.f32.mrf.mxu1 }
 0x307   : > { %2668 = vst [vmem:[%s4339_s27 + $0x38] sm:$0xff] %v2599_v8  ;;  %v2603_v13 = vadd.f32 %v2602_v1, %v4333_v35 }
 0x308   : > { %v2604_v24 = vpop.f32.mrf.mxu1 }
 0x309   : > { %2669 = vst [vmem:[%s4339_s27 + $0x40] sm:$0xff] %v2603_v13  ;;  %v2605_v10 = vadd.f32 %v2604_v24, %v4336_v7 }
 0x30a   : > { %v2606_v60 = vpop.f32.mrf.mxu1 }
 0x30b   : > { %2670 = vst [vmem:[%s4339_s27 + $0x48] sm:$0xff] %v2605_v10  ;;  %v2607_v46 = vadd.f32 %v2606_v60, %v4333_v35 }
 0x30c   : > { %v2608_v4 = vpop.f32.mrf.mxu1 }
 0x30d   : > { %2671 = vst [vmem:[%s4339_s27 + $0x50] sm:$0xff] %v2607_v46  ;;  %v2609_v43 = vadd.f32 %v2608_v4, %v4336_v7 }
 0x30e   : > { %v2612_v47 = vpop.f32.mrf.mxu1 }
 0x30f   : > { %2672 = vst [vmem:[%s4339_s27 + $0x58] sm:$0xff] %v2609_v43  ;;  %v2613_v14 = vadd.f32 %v2612_v47, %v4333_v35 }
 0x310   : > { %v2614_v17 = vpop.f32.mrf.mxu1 }
 0x311   : > { %2673 = vst [vmem:[%s4339_s27 + $0x60] sm:$0xff] %v2613_v14  ;;  %v2615_v61 = vadd.f32 %v2614_v17, %v4336_v7 }
 0x312   : > { %v2616_v29 = vpop.f32.mrf.mxu1 }
 0x313   : > { %2674 = vst [vmem:[%s4339_s27 + $0x68] sm:$0xff] %v2615_v61  ;;  %v2617_v48 = vadd.f32 %v2616_v29, %v4333_v35 }
 0x314   : > { %v2618_v12 = vpop.f32.mrf.mxu1 }
 0x315   : > { %2675 = vst [vmem:[%s4339_s27 + $0x70] sm:$0xff] %v2617_v48  ;;  %v2619_v31 = vadd.f32 %v2618_v12, %v4336_v7 }
 0x316   : > { %v2622_v63 = vpop.f32.mrf.mxu1 }
 0x317   : > { %2676 = vst [vmem:[%s4339_s27 + $0x78] sm:$0xff] %v2619_v31  ;;  %v2623_v50 = vadd.f32 %v2622_v63, %v4333_v35 }
 0x318   : > { %v2624_v15 = vpop.f32.mrf.mxu1 }
 0x319   : > { %2677 = vst [vmem:[%s4339_s27 + $0x80] sm:$0xff] %v2623_v50  ;;  %v2625_v3 = vadd.f32 %v2624_v15, %v4336_v7 }
 0x31a   : > { %v2626_v27 = vpop.f32.mrf.mxu1 }
 0x31b   : > { %2678 = vst [vmem:[%s4339_s27 + $0x88] sm:$0xff] %v2625_v3  ;;  %v2627_v49 = vadd.f32 %v2626_v27, %v4333_v35 }
 0x31c   : > { %v2628_v19 = vpop.f32.mrf.mxu1 }
 0x31d   : > { %2679 = vst [vmem:[%s4339_s27 + $0x90] sm:$0xff] %v2627_v49  ;;  %v2629_v0 = vadd.f32 %v2628_v19, %v4336_v7 }
 0x31e   : > { %v2632_v33 = vpop.f32.mrf.mxu1 }
 0x31f   : > { %2680 = vst [vmem:[%s4339_s27 + $0x98] sm:$0xff] %v2629_v0  ;;  %v2633_v53 = vadd.f32 %v2632_v33, %v4333_v35 }
 0x320   : > { %v2634_v40 = vpop.f32.mrf.mxu1 }
 0x321   : > { %2681 = vst [vmem:[%s4339_s27 + $0xa0] sm:$0xff] %v2633_v53  ;;  %v2635_v51 = vadd.f32 %v2634_v40, %v4336_v7 }
 0x322   : > { %v2636_v26 = vpop.f32.mrf.mxu1 }
 0x323   : > { %2682 = vst [vmem:[%s4339_s27 + $0xa8] sm:$0xff] %v2635_v51  ;;  %v2637_v5 = vadd.f32 %v2636_v26, %v4333_v35 }
 0x324   : > { %v2638_v2 = vpop.f32.mrf.mxu1 }
 0x325   : > { %2683 = vst [vmem:[%s4339_s27 + $0xb0] sm:$0xff] %v2637_v5  ;;  %v2639_v20 = vadd.f32 %v2638_v2, %v4336_v7 }
 0x326   : > { %v2642_v28 = vpop.f32.mrf.mxu1 }
 0x327   : > { %2684 = vst [vmem:[%s4339_s27 + $0xb8] sm:$0xff] %v2639_v20  ;;  %v2643_v52 = vadd.f32 %v2642_v28, %v4333_v35 }
 0x328   : > { %v2644_v18 = vpop.f32.mrf.mxu1 }
 0x329   : > { %2685 = vst [vmem:[%s4339_s27 + $0xc0] sm:$0xff] %v2643_v52  ;;  %v2645_v56 = vadd.f32 %v2644_v18, %v4336_v7 }
 0x32a   : > { %v2646_v32 = vpop.f32.mrf.mxu1 }
 0x32b   : > { %2686 = vst [vmem:[%s4339_s27 + $0xc8] sm:$0xff] %v2645_v56  ;;  %v2647_v21 = vadd.f32 %v2646_v32, %v4333_v35 }
 0x32c   : > { %v2648_v22 = vpop.f32.mrf.mxu1 }
 0x32d   : > { %2687 = vst [vmem:[%s4339_s27 + $0xd0] sm:$0xff] %v2647_v21  ;;  %v2649_v36 = vadd.f32 %v2648_v22, %v4336_v7 }
 0x32e   : > { %v2652_v45 = vpop.f32.mrf.mxu1 }
 0x32f   : > { %2688 = vst [vmem:[%s4339_s27 + $0xd8] sm:$0xff] %v2649_v36  ;;  %v2653_v54 = vadd.f32 %v2652_v45, %v4333_v35 }
 0x330   : > { %v2654_v30 = vpop.f32.mrf.mxu1 }
 0x331   : > { %2689 = vst [vmem:[%s4339_s27 + $0xe0] sm:$0xff] %v2653_v54  ;;  %v2655_v39 = vadd.f32 %v2654_v30, %v4336_v7 }
 0x332   : > { %v2656_v59 = vpop.f32.mrf.mxu1 }
 0x333   : > { %2690 = vst [vmem:[%s4339_s27 + $0xe8] sm:$0xff] %v2655_v39  ;;  %v2657_v11 = vadd.f32 %v2656_v59, %v4333_v35  ;;  %2700 = sbr.rel (!%p3440_p5) target bundleno = 851 (0x353), region = 72 }
 0x334   : > { %v2658_v16 = vpop.f32.mrf.mxu1 }
 0x335   : > { %2691 = vst [vmem:[%s4339_s27 + $0xf0] sm:$0xff] %v2657_v11  ;;  %v2659_v23 = vadd.f32 %v2658_v16, %v4336_v7 }
 0x337   : > { %2692 = vst [vmem:[%s4339_s27 + $0xf8] sm:$0xff] %v2659_v23 }
 0x338   : > { %s4503_s26 = smov (!%p2703_p11, %s2702_s26), 16 }
 0x339   : > { %s4411_s14 = sshll.u32 %s4503_s26, 8 }
 0x33a   : > { %s2708_s19 = ssub.s32 4096, %s4411_s14 }
 0x33b   : > { %2709 = vsyncadd %s4406_s18, %s2708_s19  ;;  %p2979_p12 = scmp.ne.s32.totalorder %s4411_s14, 0  ;;  %s2989_s23 = sshll.u32 %s3423_s25, 12 }
 0x33c   : > { %s4420_s30 = scalar_lea.hbm %s4478_s12, %s2989_s23  ;;  %s2715_s15 = sshll.u32 %s4339_s27, 4  ;;  %s4423_s15 = int_to_ptr.vmem [resolvable:$true] %s2715_s15 }
 0x33d   : > { %s3271_s29 = scalar_lea.vmem %s4423_s15, %s4411_s14  ;;  %s3334_s17 = smov [#allocation2]  }
 0x33e   : > { %p3272_p13 = scmp.ne.s32.totalorder %s4423_s15, %s3271_s29  ;;  %s3275_s20 = sshll.u32 %s3334_s17, 4  ;;  %s3276_s20 = int_to_ptr.vmem [resolvable:$false] %s3275_s20 }
 0x33f   : > { %s3277_s25 = scalar_lea.vmem %s3276_s20, 8192  ;;  %p3278_p2 = scmp.lt.s32.totalorder %s4423_s15, %s3276_s20 }
 0x340   : > { %p3273_p0 = pnand %p3272_p13, %p2979_p12  ;;  %p3279_p3 = scmp.lt.s32.totalorder %s3277_s25, %s3271_s29 }
 0x342   : > { %p3274_p1 = pneg %p3273_p0  ;;  %p3280_p4 = por %p3279_p3, %p3278_p2 }
 0x344   : > { %p3281_p5 = pnand %p3280_p4, %p3274_p1 }
 0x346   : > { %3284 = shalt.err (!%p3281_p5)
}
 0x347   : > { %s3285_s16 = scalar_lea.hbm %s4420_s30, %s4411_s14  ;;  %s3289_s19 = scalar_lea.hbm %s4478_s12, 6400 }
 0x348   : > { %p3286_p7 = scmp.ne.s32.totalorder %s4420_s30, %s3285_s16  ;;  %p3290_p10 = scmp.lt.s32.totalorder %s4420_s30, %s4478_s12 }
 0x349   : > { %p3291_p11 = scmp.lt.s32.totalorder %s3289_s19, %s3285_s16 }
 0x34a   : > { %p3287_p8 = pnand %p3286_p7, %p2979_p12 }
 0x34b   : > { %p3292_p13 = por %p3291_p11, %p3290_p10 }
 0x34c   : > { %p3288_p9 = pneg %p3287_p8 }
 0x34e   : > { %p3293_p0 = pnand %p3292_p13, %p3288_p9 }
 0x350   : > { %3296 = shalt.err (!%p3293_p0)
}
 0x351   : > { %s3335_s13 = smov 256   ;;  %s3336_s29 = smov 16  }
 0x352   : > { %2721 = dma.vmem_to_hbm [thread:$0]  (%p2979_p12), %s4423_s15, %s4411_s14, %s4420_s30, %s4406_s18, %s3335_s13, %s3335_s13, %s3336_s29  }
 0x353 PF: > { %p2995_p1 = scmp.ge.s32.totalorder %s3331_s24, 2  ;;  %s2730_s20 = sand.u32 1, %s3319_s21  }
 0x354   : > { %s2731_s25 = scalar_lea.sflag [#allocation3], %s2730_s20 }
 0x355   : > { %p2992_p2 = pnand %p2995_p1, %p3444_p6 }
 0x357   : > { %p2993_p3 = pneg %p2992_p2 }
 0x359   : > { %3314 = dma.done.wait (%p2993_p3), %s2731_s25, 4096  }
 0x35a   : > { %3316 = vsyncadd (%p2993_p3), %s2731_s25, 4294963200  ;;  %s4497_s24 = sld [smem:[#allocation6_spill]]  ;;  %s4500_s21 = smov %s3323_s22 }
 0x35b   : > { %s4498_s16 = sld [smem:[#allocation5_spill]] }
 0x35c   : > { %s4499_s23 = sld [smem:[#allocation7_spill]] }
 0x360   : > { %p22_p4 = scmp.ge.s32.totalorder %s4497_s24, 4  }
 0x361   : > { %s4501_s22 = smov %s4498_s16 }
 0x362   :  { %24 = sbr.rel (!%p22_p4) target bundleno = 3 (0x3), region = 106 }
 0x367   :  { %2736 = vsyncpa [#allocation3], 1 }
 0x368   :  { %2738 = vsyncpa [#allocation3 + $0x1], 1 }

</bundles_post_ra>
